<compile_context>
chip_gen: v5e
topology: v5e:2x2
jax: 0.10.0
libtpu: 0.0.40
codegen_flags: <defaults>
</compile_context>

<pallas_src>
import jax
import jax.numpy as jnp
from jax import lax
from jax.experimental import pallas as pl
from jax.experimental.pallas import tpu as pltpu

# ----------------------- configuration (small, synthetic) -----------------------
BATCH = 8          # also the LSTM "sequence length" (PyTorch unbatched quirk)
FEATURES = 4
SEQ_LEN = 16
D_MODEL = 32
PRED_LEN = 8
EMBED_DIM = 10     # len(label_encoders[-1].classes_)
LANE = 128         # padded lane width for the out_layer / softmax epilogue
PE = PRED_LEN * EMBED_DIM


# --------------------------- fused forward Pallas kernel ------------------------
def _pattn_fused_kernel(x_ref, wpack_ref, w01_ref, out_ref, hseq_ref):
    """(in_layer + layer-0 i->h) matmul -> unrolled 2-layer LSTM (time==batch)
       -> padded out_layer -> matmul-reduced grouped softmax, in one kernel."""
    B, FS = x_ref.shape
    D = w01_ref.shape[0]
    G = 4 * D                      # packed gate width (i,f,g,o)
    W = out_ref.shape[1]           # 128 (lane-padded logits width)

    # ---- unpack the single packed weight slab (static sublane slices) ----
    o = 0
    wc    = wpack_ref[o:o + FS, :]; o += FS    # w_in @ w_ih0           (FS, G)
    w_hh1 = wpack_ref[o:o + D,  :]; o += D     # layer-1 recurrent      (D, G)
    w_out = wpack_ref[o:o + D,  :]; o += D     # out_layer, lane-padded (D, W)
    red_m = wpack_ref[o:o + W,  :]; o += W     # block-diag group-sum   (W, W)
    bias  = wpack_ref[o:o + 8,  :]             # rows 0..2: bc, b1, b_out(-1e9 pad)
    bc, b1, b_out = bias[0:1, :], bias[1:2, :], bias[2:3, :]
    w01 = w01_ref[...]                         # [w_hh0 | w_ih1]        (D, 2G)

    # ---- in_layer folded into layer-0 input->hidden projection (hoisted out of
    #      the recurrence as one (B, FS) @ (FS, G) matmul) ----
    gates0_x = jnp.dot(x_ref[...], wc, preferred_element_type=jnp.float32) + bc

    def activate(gates):
        # Two full-width transcendental pushes; gates picked by static slices.
        sg = jax.nn.sigmoid(gates)
        th = jnp.tanh(gates)
        # PyTorch gate order: i, f, g, o.
        return sg[:, 0:D], sg[:, D:2 * D], th[:, 2 * D:3 * D], sg[:, 3 * D:4 * D]

    zd = jnp.zeros((1, D), jnp.float32)
    h0, c0, h1, c1 = zd, zd, zd, zd
    rec0 = jnp.zeros((1, G), jnp.float32)      # carried h0_{t-1} @ w_hh0

    for t in range(B):                          # B is static -> fully unrolled
        # layer 0: recurrent contribution was computed by the previous step's
        # fused 256-wide push; only gate math remains here.
        g0 = gates0_x[t:t + 1, :] + rec0
        i0, f0, gg0, o0 = activate(g0)
        c0 = f0 * c0 + i0 * gg0
        h0 = o0 * jnp.tanh(c0)

        # One 256-wide MXU push: [h0@w_hh0 (next step's rec0) | h0@w_ih1].
        fused = jnp.dot(h0, w01, preferred_element_type=jnp.float32)   # (1, 2G)
        rec0 = fused[:, 0:G]
        # layer 1: the h1@w_hh1 push depends only on h1_{t-1} (overlaps layer-0).
        g1 = (fused[:, G:2 * G]
              + jnp.dot(h1, w_hh1, preferred_element_type=jnp.float32) + b1)
        i1, f1, gg1, o1 = activate(g1)
        c1 = f1 * c1 + i1 * gg1
        h1 = o1 * jnp.tanh(c1)
        hseq_ref[t:t + 1, :] = h1               # per-row store, off the serial chain

    # ---- out_layer on lane-padded weights (N = 128, dense MXU tile).
    #      Padded bias lanes are -1e9, so they never win the max and exp -> 0. ----
    hseq = hseq_ref[...]                                               # (B, D)
    logits = jnp.dot(hseq, w_out, preferred_element_type=jnp.float32) + b_out

    # ---- grouped softmax: row-wide max, full-width exp, group sums via one
    #      block-diagonal matmul, approx reciprocal + one Newton step. ----
    m = jnp.max(logits, axis=-1, keepdims=True)
    e = jnp.exp(logits - m)
    s = jnp.dot(e, red_m, preferred_element_type=jnp.float32)          # per-lane group sum
    inv = pl.reciprocal(s, approx=True)
    inv = inv * (2.0 - s * inv)                                        # Newton -> ~exact
    out_ref[...] = e * inv                                             # dense (B,128) store


# ------------------------- one-time parameter preparation -----------------------
def prepare_params(p):
    """Fuse / pad / pack weights ONCE at load time (not per forward call)."""
    D = p["w_hh0"].shape[0]
    pe = p["w_out"].shape[1]
    pad = LANE - pe

    wc = p["w_in"] @ p["w_ih0"]                                    # (FS, 4D)
    bc = p["b_in"] @ p["w_ih0"] + p["b0"]                          # (1, 4D)
    w01 = jnp.concatenate([p["w_hh0"], p["w_ih1"]], axis=1)        # (D, 8D) = (32,256)

    w_out_p = jnp.pad(p["w_out"], ((0, 0), (0, pad)))              # (D, 128)
    b_out_p = jnp.concatenate(
        [p["b_out"], jnp.full((1, pad), -1e9, jnp.float32)], axis=1)  # mask pad lanes

    # Block-diagonal ones matrix: (e @ red_m)[:, k] = sum of e over k's group.
    lane = jnp.arange(LANE)
    grp = lane // EMBED_DIM
    valid = lane < pe
    red_m = ((grp[:, None] == grp[None, :])
             & valid[:, None] & valid[None, :]).astype(jnp.float32)
    red_m = red_m.at[0, pe:].set(1.0)      # keep padded-lane denominators > 0 (no inf/NaN)

    bias_blk = jnp.zeros((8, LANE), jnp.float32)
    bias_blk = bias_blk.at[0].set(bc[0]).at[1].set(p["b1"][0]).at[2].set(b_out_p[0])

    # Single packed slab of all 128-lane-wide constants (264, 128).
    w_pack = jnp.concatenate([wc, p["w_hh1"], w_out_p, red_m, bias_blk], axis=0)
    return {"w_pack": w_pack, "w01": w01}


# --------------------------------- wrapper --------------------------------------
@jax.jit
def pattn_forward(x, fused):
    B = x.shape[0]
    x_flat = x.reshape(B, -1).astype(jnp.float32)
    D = fused["w01"].shape[0]

    vmem = pl.BlockSpec(memory_space=pltpu.MemorySpace.VMEM)
    probs_pad = pl.pallas_call(
        _pattn_fused_kernel,
        out_shape=jax.ShapeDtypeStruct((B, LANE), jnp.float32),
        in_specs=[vmem, vmem, vmem],
        out_specs=vmem,
        scratch_shapes=[pltpu.VMEM((B, D), jnp.float32)],   # hidden-sequence rows
    )(x_flat, fused["w_pack"], fused["w01"])

    return probs_pad[:, :PE].reshape(B, PRED_LEN, EMBED_DIM)


# ------------------------------ pure-JAX reference ------------------------------
def pattn_reference(x, p):
    B, F, S = x.shape
    xf = x.reshape(B, F * S).astype(jnp.float32)
    D = p["w_in"].shape[1]
    y0 = xf @ p["w_in"] + p["b_in"]

    def cell(x_t, h, c, w_ih, w_hh, b):
        gates = x_t @ w_ih + h @ w_hh + b
        i = jax.nn.sigmoid(gates[0:D])
        f = jax.nn.sigmoid(gates[D:2 * D])
        g = jnp.tanh(gates[2 * D:3 * D])
        o = jax.nn.sigmoid(gates[3 * D:4 * D])
        c = f * c + i * g
        h = o * jnp.tanh(c)
        return h, c

    def step(carry, x_t):
        h0, c0, h1, c1 = carry
        h0, c0 = cell(x_t, h0, c0, p["w_ih0"], p["w_hh0"], p["b0"][0])
        h1, c1 = cell(h0, h1, c1, p["w_ih1"], p["w_hh1"], p["b1"][0])
        return (h0, c0, h1, c1), h1

    z = jnp.zeros((D,), jnp.float32)
    _, hseq = lax.scan(step, (z, z, z, z), y0)
    logits = hseq @ p["w_out"] + p["b_out"]
    return jax.nn.softmax(logits.reshape(B, PRED_LEN, -1), axis=2)


# ------------------------------- parameter init ---------------------------------
def init_params(key):
    D, FS, pe = D_MODEL, FEATURES * SEQ_LEN, PRED_LEN * EMBED_DIM
    ks = jax.random.split(key, 12)
    s = 0.1
    return {
        # Linear weights stored pre-transposed to (in, out).
        "w_in":  s * jax.random.normal(ks[0], (FS, D), jnp.float32),
        "b_in":  s * jax.random.normal(ks[1], (1, D), jnp.float32),
        # LSTM layer 0 (gate order i,f,g,o packed on the output axis; bias = b_ih+b_hh)
        "w_ih0": s * jax.random.normal(ks[2], (D, 4 * D), jnp.float32),
        "w_hh0": s * jax.random.normal(ks[3], (D, 4 * D), jnp.float32),
        "b0":    s * jax.random.normal(ks[4], (1, 4 * D), jnp.float32),
        # LSTM layer 1
        "w_ih1": s * jax.random.normal(ks[5], (D, 4 * D), jnp.float32),
        "w_hh1": s * jax.random.normal(ks[6], (D, 4 * D), jnp.float32),
        "b1":    s * jax.random.normal(ks[7], (1, 4 * D), jnp.float32),
        # out_layer
        "w_out": s * jax.random.normal(ks[8], (D, pe), jnp.float32),
        "b_out": s * jax.random.normal(ks[9], (1, pe), jnp.float32),
    }


if __name__ == "__main__":
    key = jax.random.PRNGKey(0)
    k_x, k_p = jax.random.split(key)
    x = jax.random.normal(k_x, (BATCH, FEATURES, SEQ_LEN), jnp.float32)
    params = init_params(k_p)

    fused = jax.tree.map(jax.block_until_ready, prepare_params(params))  # once, at load time

    out = jax.block_until_ready(pattn_forward(x, fused))
    ref = jax.block_until_ready(pattn_reference(x, params))

    assert out.shape == (BATCH, PRED_LEN, EMBED_DIM), out.shape
    # Probabilities sum to 1 along the class axis.
    assert jnp.allclose(out.sum(axis=2), 1.0, atol=1e-3)
    assert jnp.allclose(out, ref, atol=2e-3, rtol=2e-3), float(jnp.max(jnp.abs(out - ref)))

    print("KERNEL_OK")
</pallas_src>

<mosaic_0001>
module attributes {stable_mosaic.version = 11 : i64} {
  func.func @_pattn_fused_kernel(%arg0: memref<8x64xf32, #tpu.memory_space<vmem>>, %arg1: memref<264x128xf32, #tpu.memory_space<vmem>>, %arg2: memref<32x256xf32, #tpu.memory_space<vmem>>, %arg3: memref<8x128xf32, #tpu.memory_space<vmem>>, %arg4: memref<8x32xf32, #tpu.memory_space<vmem>>) attributes {dimension_semantics = [], scalar_prefetch = 0 : i64, scratch_operands = 1 : i64, tpu.core_type = #tpu.core_type<tc>} {
    %c0 = arith.constant 0 : index
    %c0_0 = arith.constant 0 : index
    %0 = vector.load %arg1[%c0, %c0_0] : memref<264x128xf32, #tpu.memory_space<vmem>>, vector<64x128xf32>
    %c64 = arith.constant 64 : index
    %c0_1 = arith.constant 0 : index
    %1 = vector.load %arg1[%c64, %c0_1] : memref<264x128xf32, #tpu.memory_space<vmem>>, vector<32x128xf32>
    %c96 = arith.constant 96 : index
    %c0_2 = arith.constant 0 : index
    %2 = vector.load %arg1[%c96, %c0_2] : memref<264x128xf32, #tpu.memory_space<vmem>>, vector<32x128xf32>
    %c128 = arith.constant 128 : index
    %c0_3 = arith.constant 0 : index
    %3 = vector.load %arg1[%c128, %c0_3] : memref<264x128xf32, #tpu.memory_space<vmem>>, vector<128x128xf32>
    %c256 = arith.constant 256 : index
    %c0_4 = arith.constant 0 : index
    %4 = vector.load %arg1[%c256, %c0_4] : memref<264x128xf32, #tpu.memory_space<vmem>>, vector<8x128xf32>
    %5 = vector.extract_strided_slice %4 {offsets = [0, 0], sizes = [1, 128], strides = [1, 1]} : vector<8x128xf32> to vector<1x128xf32>
    %6 = vector.extract_strided_slice %4 {offsets = [1, 0], sizes = [1, 128], strides = [1, 1]} : vector<8x128xf32> to vector<1x128xf32>
    %7 = vector.extract_strided_slice %4 {offsets = [2, 0], sizes = [1, 128], strides = [1, 1]} : vector<8x128xf32> to vector<1x128xf32>
    %c0_5 = arith.constant 0 : index
    %c0_6 = arith.constant 0 : index
    %8 = vector.load %arg2[%c0_5, %c0_6] : memref<32x256xf32, #tpu.memory_space<vmem>>, vector<32x256xf32>
    %c0_7 = arith.constant 0 : index
    %c0_8 = arith.constant 0 : index
    %9 = vector.load %arg0[%c0_7, %c0_8] : memref<8x64xf32, #tpu.memory_space<vmem>>, vector<8x64xf32>
    %cst = arith.constant dense<0.000000e+00> : vector<8x128xf32>
    %10 = tpu.matmul %9, %0, %cst {dimension_numbers = #tpu.dot_dimension_numbers<[1], [0], [0], [1], [0, 0, 1, 1], [], []>} : vector<8x64xf32>, vector<64x128xf32>, vector<8x128xf32> -> vector<8x128xf32>
    %11 = vector.broadcast %5 : vector<1x128xf32> to vector<8x128xf32>
    %12 = arith.addf %10, %11 : vector<8x128xf32>
    %cst_9 = arith.constant 0.000000e+00 : f32
    %13 = vector.broadcast %cst_9 : f32 to vector<1x32xf32>
    %cst_10 = arith.constant 0.000000e+00 : f32
    %14 = vector.broadcast %cst_10 : f32 to vector<1x128xf32>
    %15 = vector.extract_strided_slice %12 {offsets = [0, 0], sizes = [1, 128], strides = [1, 1]} : vector<8x128xf32> to vector<1x128xf32>
    %16 = arith.addf %15, %14 : vector<1x128xf32>
    %17 = arith.negf %16 : vector<1x128xf32>
    %18 = math.exp %17 : vector<1x128xf32>
    %cst_11 = arith.constant 1.000000e+00 : f32
    %19 = vector.broadcast %cst_11 : f32 to vector<1x128xf32>
    %20 = arith.addf %19, %18 : vector<1x128xf32>
    %21 = arith.divf %19, %20 : vector<1x128xf32>
    %22 = math.tanh %16 : vector<1x128xf32>
    %23 = vector.extract_strided_slice %21 {offsets = [0, 0], sizes = [1, 32], strides = [1, 1]} : vector<1x128xf32> to vector<1x32xf32>
    %24 = vector.extract_strided_slice %21 {offsets = [0, 32], sizes = [1, 32], strides = [1, 1]} : vector<1x128xf32> to vector<1x32xf32>
    %25 = vector.extract_strided_slice %22 {offsets = [0, 64], sizes = [1, 32], strides = [1, 1]} : vector<1x128xf32> to vector<1x32xf32>
    %26 = vector.extract_strided_slice %21 {offsets = [0, 96], sizes = [1, 32], strides = [1, 1]} : vector<1x128xf32> to vector<1x32xf32>
    %27 = arith.mulf %24, %13 : vector<1x32xf32>
    %28 = arith.mulf %23, %25 : vector<1x32xf32>
    %29 = arith.addf %27, %28 : vector<1x32xf32>
    %30 = math.tanh %29 : vector<1x32xf32>
    %31 = arith.mulf %26, %30 : vector<1x32xf32>
    %cst_12 = arith.constant dense<0.000000e+00> : vector<1x256xf32>
    %32 = tpu.matmul %31, %8, %cst_12 {dimension_numbers = #tpu.dot_dimension_numbers<[1], [0], [0], [1], [0, 0, 1, 1], [], []>} : vector<1x32xf32>, vector<32x256xf32>, vector<1x256xf32> -> vector<1x256xf32>
    %33 = vector.extract_strided_slice %32 {offsets = [0, 0], sizes = [1, 128], strides = [1, 1]} : vector<1x256xf32> to vector<1x128xf32>
    %34 = vector.extract_strided_slice %32 {offsets = [0, 128], sizes = [1, 128], strides = [1, 1]} : vector<1x256xf32> to vector<1x128xf32>
    %cst_13 = arith.constant dense<0.000000e+00> : vector<1x128xf32>
    %35 = tpu.matmul %13, %1, %cst_13 {dimension_numbers = #tpu.dot_dimension_numbers<[1], [0], [0], [1], [0, 0, 1, 1], [], []>} : vector<1x32xf32>, vector<32x128xf32>, vector<1x128xf32> -> vector<1x128xf32>
    %36 = arith.addf %34, %35 : vector<1x128xf32>
    %37 = arith.addf %36, %6 : vector<1x128xf32>
    %38 = arith.negf %37 : vector<1x128xf32>
    %39 = math.exp %38 : vector<1x128xf32>
    %cst_14 = arith.constant 1.000000e+00 : f32
    %40 = vector.broadcast %cst_14 : f32 to vector<1x128xf32>
    %41 = arith.addf %40, %39 : vector<1x128xf32>
    %42 = arith.divf %40, %41 : vector<1x128xf32>
    %43 = math.tanh %37 : vector<1x128xf32>
    %44 = vector.extract_strided_slice %42 {offsets = [0, 0], sizes = [1, 32], strides = [1, 1]} : vector<1x128xf32> to vector<1x32xf32>
    %45 = vector.extract_strided_slice %42 {offsets = [0, 32], sizes = [1, 32], strides = [1, 1]} : vector<1x128xf32> to vector<1x32xf32>
    %46 = vector.extract_strided_slice %43 {offsets = [0, 64], sizes = [1, 32], strides = [1, 1]} : vector<1x128xf32> to vector<1x32xf32>
    %47 = vector.extract_strided_slice %42 {offsets = [0, 96], sizes = [1, 32], strides = [1, 1]} : vector<1x128xf32> to vector<1x32xf32>
    %48 = arith.mulf %45, %13 : vector<1x32xf32>
    %49 = arith.mulf %44, %46 : vector<1x32xf32>
    %50 = arith.addf %48, %49 : vector<1x32xf32>
    %51 = math.tanh %50 : vector<1x32xf32>
    %52 = arith.mulf %47, %51 : vector<1x32xf32>
    %c0_15 = arith.constant 0 : index
    %c0_16 = arith.constant 0 : index
    %53 = vector.load %arg4[%c0_15, %c0_16] : memref<8x32xf32, #tpu.memory_space<vmem>>, vector<1x32xf32>
    tpu.vector_store %arg4[%c0_15, %c0_16], %52 {strides = array<i32>} : memref<8x32xf32, #tpu.memory_space<vmem>>, vector<1x32xf32>,
    %54 = vector.extract_strided_slice %12 {offsets = [1, 0], sizes = [1, 128], strides = [1, 1]} : vector<8x128xf32> to vector<1x128xf32>
    %55 = arith.addf %54, %33 : vector<1x128xf32>
    %56 = arith.negf %55 : vector<1x128xf32>
    %57 = math.exp %56 : vector<1x128xf32>
    %cst_17 = arith.constant 1.000000e+00 : f32
    %58 = vector.broadcast %cst_17 : f32 to vector<1x128xf32>
    %59 = arith.addf %58, %57 : vector<1x128xf32>
    %60 = arith.divf %58, %59 : vector<1x128xf32>
    %61 = math.tanh %55 : vector<1x128xf32>
    %62 = vector.extract_strided_slice %60 {offsets = [0, 0], sizes = [1, 32], strides = [1, 1]} : vector<1x128xf32> to vector<1x32xf32>
    %63 = vector.extract_strided_slice %60 {offsets = [0, 32], sizes = [1, 32], strides = [1, 1]} : vector<1x128xf32> to vector<1x32xf32>
    %64 = vector.extract_strided_slice %61 {offsets = [0, 64], sizes = [1, 32], strides = [1, 1]} : vector<1x128xf32> to vector<1x32xf32>
    %65 = vector.extract_strided_slice %60 {offsets = [0, 96], sizes = [1, 32], strides = [1, 1]} : vector<1x128xf32> to vector<1x32xf32>
    %66 = arith.mulf %63, %29 : vector<1x32xf32>
    %67 = arith.mulf %62, %64 : vector<1x32xf32>
    %68 = arith.addf %66, %67 : vector<1x32xf32>
    %69 = math.tanh %68 : vector<1x32xf32>
    %70 = arith.mulf %65, %69 : vector<1x32xf32>
    %cst_18 = arith.constant dense<0.000000e+00> : vector<1x256xf32>
    %71 = tpu.matmul %70, %8, %cst_18 {dimension_numbers = #tpu.dot_dimension_numbers<[1], [0], [0], [1], [0, 0, 1, 1], [], []>} : vector<1x32xf32>, vector<32x256xf32>, vector<1x256xf32> -> vector<1x256xf32>
    %72 = vector.extract_strided_slice %71 {offsets = [0, 0], sizes = [1, 128], strides = [1, 1]} : vector<1x256xf32> to vector<1x128xf32>
    %73 = vector.extract_strided_slice %71 {offsets = [0, 128], sizes = [1, 128], strides = [1, 1]} : vector<1x256xf32> to vector<1x128xf32>
    %cst_19 = arith.constant dense<0.000000e+00> : vector<1x128xf32>
    %74 = tpu.matmul %52, %1, %cst_19 {dimension_numbers = #tpu.dot_dimension_numbers<[1], [0], [0], [1], [0, 0, 1, 1], [], []>} : vector<1x32xf32>, vector<32x128xf32>, vector<1x128xf32> -> vector<1x128xf32>
    %75 = arith.addf %73, %74 : vector<1x128xf32>
    %76 = arith.addf %75, %6 : vector<1x128xf32>
    %77 = arith.negf %76 : vector<1x128xf32>
    %78 = math.exp %77 : vector<1x128xf32>
    %cst_20 = arith.constant 1.000000e+00 : f32
    %79 = vector.broadcast %cst_20 : f32 to vector<1x128xf32>
    %80 = arith.addf %79, %78 : vector<1x128xf32>
    %81 = arith.divf %79, %80 : vector<1x128xf32>
    %82 = math.tanh %76 : vector<1x128xf32>
    %83 = vector.extract_strided_slice %81 {offsets = [0, 0], sizes = [1, 32], strides = [1, 1]} : vector<1x128xf32> to vector<1x32xf32>
    %84 = vector.extract_strided_slice %81 {offsets = [0, 32], sizes = [1, 32], strides = [1, 1]} : vector<1x128xf32> to vector<1x32xf32>
    %85 = vector.extract_strided_slice %82 {offsets = [0, 64], sizes = [1, 32], strides = [1, 1]} : vector<1x128xf32> to vector<1x32xf32>
    %86 = vector.extract_strided_slice %81 {offsets = [0, 96], sizes = [1, 32], strides = [1, 1]} : vector<1x128xf32> to vector<1x32xf32>
    %87 = arith.mulf %84, %50 : vector<1x32xf32>
    %88 = arith.mulf %83, %85 : vector<1x32xf32>
    %89 = arith.addf %87, %88 : vector<1x32xf32>
    %90 = math.tanh %89 : vector<1x32xf32>
    %91 = arith.mulf %86, %90 : vector<1x32xf32>
    %c1 = arith.constant 1 : index
    %c0_21 = arith.constant 0 : index
    %92 = vector.load %arg4[%c1, %c0_21] : memref<8x32xf32, #tpu.memory_space<vmem>>, vector<1x32xf32>
    tpu.vector_store %arg4[%c1, %c0_21], %91 {strides = array<i32>} : memref<8x32xf32, #tpu.memory_space<vmem>>, vector<1x32xf32>,
    %93 = vector.extract_strided_slice %12 {offsets = [2, 0], sizes = [1, 128], strides = [1, 1]} : vector<8x128xf32> to vector<1x128xf32>
    %94 = arith.addf %93, %72 : vector<1x128xf32>
    %95 = arith.negf %94 : vector<1x128xf32>
    %96 = math.exp %95 : vector<1x128xf32>
    %cst_22 = arith.constant 1.000000e+00 : f32
    %97 = vector.broadcast %cst_22 : f32 to vector<1x128xf32>
    %98 = arith.addf %97, %96 : vector<1x128xf32>
    %99 = arith.divf %97, %98 : vector<1x128xf32>
    %100 = math.tanh %94 : vector<1x128xf32>
    %101 = vector.extract_strided_slice %99 {offsets = [0, 0], sizes = [1, 32], strides = [1, 1]} : vector<1x128xf32> to vector<1x32xf32>
    %102 = vector.extract_strided_slice %99 {offsets = [0, 32], sizes = [1, 32], strides = [1, 1]} : vector<1x128xf32> to vector<1x32xf32>
    %103 = vector.extract_strided_slice %100 {offsets = [0, 64], sizes = [1, 32], strides = [1, 1]} : vector<1x128xf32> to vector<1x32xf32>
    %104 = vector.extract_strided_slice %99 {offsets = [0, 96], sizes = [1, 32], strides = [1, 1]} : vector<1x128xf32> to vector<1x32xf32>
    %105 = arith.mulf %102, %68 : vector<1x32xf32>
    %106 = arith.mulf %101, %103 : vector<1x32xf32>
    %107 = arith.addf %105, %106 : vector<1x32xf32>
    %108 = math.tanh %107 : vector<1x32xf32>
    %109 = arith.mulf %104, %108 : vector<1x32xf32>
    %cst_23 = arith.constant dense<0.000000e+00> : vector<1x256xf32>
    %110 = tpu.matmul %109, %8, %cst_23 {dimension_numbers = #tpu.dot_dimension_numbers<[1], [0], [0], [1], [0, 0, 1, 1], [], []>} : vector<1x32xf32>, vector<32x256xf32>, vector<1x256xf32> -> vector<1x256xf32>
    %111 = vector.extract_strided_slice %110 {offsets = [0, 0], sizes = [1, 128], strides = [1, 1]} : vector<1x256xf32> to vector<1x128xf32>
    %112 = vector.extract_strided_slice %110 {offsets = [0, 128], sizes = [1, 128], strides = [1, 1]} : vector<1x256xf32> to vector<1x128xf32>
    %cst_24 = arith.constant dense<0.000000e+00> : vector<1x128xf32>
    %113 = tpu.matmul %91, %1, %cst_24 {dimension_numbers = #tpu.dot_dimension_numbers<[1], [0], [0], [1], [0, 0, 1, 1], [], []>} : vector<1x32xf32>, vector<32x128xf32>, vector<1x128xf32> -> vector<1x128xf32>
    %114 = arith.addf %112, %113 : vector<1x128xf32>
    %115 = arith.addf %114, %6 : vector<1x128xf32>
    %116 = arith.negf %115 : vector<1x128xf32>
    %117 = math.exp %116 : vector<1x128xf32>
    %cst_25 = arith.constant 1.000000e+00 : f32
    %118 = vector.broadcast %cst_25 : f32 to vector<1x128xf32>
    %119 = arith.addf %118, %117 : vector<1x128xf32>
    %120 = arith.divf %118, %119 : vector<1x128xf32>
    %121 = math.tanh %115 : vector<1x128xf32>
    %122 = vector.extract_strided_slice %120 {offsets = [0, 0], sizes = [1, 32], strides = [1, 1]} : vector<1x128xf32> to vector<1x32xf32>
    %123 = vector.extract_strided_slice %120 {offsets = [0, 32], sizes = [1, 32], strides = [1, 1]} : vector<1x128xf32> to vector<1x32xf32>
    %124 = vector.extract_strided_slice %121 {offsets = [0, 64], sizes = [1, 32], strides = [1, 1]} : vector<1x128xf32> to vector<1x32xf32>
    %125 = vector.extract_strided_slice %120 {offsets = [0, 96], sizes = [1, 32], strides = [1, 1]} : vector<1x128xf32> to vector<1x32xf32>
    %126 = arith.mulf %123, %89 : vector<1x32xf32>
    %127 = arith.mulf %122, %124 : vector<1x32xf32>
    %128 = arith.addf %126, %127 : vector<1x32xf32>
    %129 = math.tanh %128 : vector<1x32xf32>
    %130 = arith.mulf %125, %129 : vector<1x32xf32>
    %c2 = arith.constant 2 : index
    %c0_26 = arith.constant 0 : index
    %131 = vector.load %arg4[%c2, %c0_26] : memref<8x32xf32, #tpu.memory_space<vmem>>, vector<1x32xf32>
    tpu.vector_store %arg4[%c2, %c0_26], %130 {strides = array<i32>} : memref<8x32xf32, #tpu.memory_space<vmem>>, vector<1x32xf32>,
    %132 = vector.extract_strided_slice %12 {offsets = [3, 0], sizes = [1, 128], strides = [1, 1]} : vector<8x128xf32> to vector<1x128xf32>
    %133 = arith.addf %132, %111 : vector<1x128xf32>
    %134 = arith.negf %133 : vector<1x128xf32>
    %135 = math.exp %134 : vector<1x128xf32>
    %cst_27 = arith.constant 1.000000e+00 : f32
    %136 = vector.broadcast %cst_27 : f32 to vector<1x128xf32>
    %137 = arith.addf %136, %135 : vector<1x128xf32>
    %138 = arith.divf %136, %137 : vector<1x128xf32>
    %139 = math.tanh %133 : vector<1x128xf32>
    %140 = vector.extract_strided_slice %138 {offsets = [0, 0], sizes = [1, 32], strides = [1, 1]} : vector<1x128xf32> to vector<1x32xf32>
    %141 = vector.extract_strided_slice %138 {offsets = [0, 32], sizes = [1, 32], strides = [1, 1]} : vector<1x128xf32> to vector<1x32xf32>
    %142 = vector.extract_strided_slice %139 {offsets = [0, 64], sizes = [1, 32], strides = [1, 1]} : vector<1x128xf32> to vector<1x32xf32>
    %143 = vector.extract_strided_slice %138 {offsets = [0, 96], sizes = [1, 32], strides = [1, 1]} : vector<1x128xf32> to vector<1x32xf32>
    %144 = arith.mulf %141, %107 : vector<1x32xf32>
    %145 = arith.mulf %140, %142 : vector<1x32xf32>
    %146 = arith.addf %144, %145 : vector<1x32xf32>
    %147 = math.tanh %146 : vector<1x32xf32>
    %148 = arith.mulf %143, %147 : vector<1x32xf32>
    %cst_28 = arith.constant dense<0.000000e+00> : vector<1x256xf32>
    %149 = tpu.matmul %148, %8, %cst_28 {dimension_numbers = #tpu.dot_dimension_numbers<[1], [0], [0], [1], [0, 0, 1, 1], [], []>} : vector<1x32xf32>, vector<32x256xf32>, vector<1x256xf32> -> vector<1x256xf32>
    %150 = vector.extract_strided_slice %149 {offsets = [0, 0], sizes = [1, 128], strides = [1, 1]} : vector<1x256xf32> to vector<1x128xf32>
    %151 = vector.extract_strided_slice %149 {offsets = [0, 128], sizes = [1, 128], strides = [1, 1]} : vector<1x256xf32> to vector<1x128xf32>
    %cst_29 = arith.constant dense<0.000000e+00> : vector<1x128xf32>
    %152 = tpu.matmul %130, %1, %cst_29 {dimension_numbers = #tpu.dot_dimension_numbers<[1], [0], [0], [1], [0, 0, 1, 1], [], []>} : vector<1x32xf32>, vector<32x128xf32>, vector<1x128xf32> -> vector<1x128xf32>
    %153 = arith.addf %151, %152 : vector<1x128xf32>
    %154 = arith.addf %153, %6 : vector<1x128xf32>
    %155 = arith.negf %154 : vector<1x128xf32>
    %156 = math.exp %155 : vector<1x128xf32>
    %cst_30 = arith.constant 1.000000e+00 : f32
    %157 = vector.broadcast %cst_30 : f32 to vector<1x128xf32>
    %158 = arith.addf %157, %156 : vector<1x128xf32>
    %159 = arith.divf %157, %158 : vector<1x128xf32>
    %160 = math.tanh %154 : vector<1x128xf32>
    %161 = vector.extract_strided_slice %159 {offsets = [0, 0], sizes = [1, 32], strides = [1, 1]} : vector<1x128xf32> to vector<1x32xf32>
    %162 = vector.extract_strided_slice %159 {offsets = [0, 32], sizes = [1, 32], strides = [1, 1]} : vector<1x128xf32> to vector<1x32xf32>
    %163 = vector.extract_strided_slice %160 {offsets = [0, 64], sizes = [1, 32], strides = [1, 1]} : vector<1x128xf32> to vector<1x32xf32>
    %164 = vector.extract_strided_slice %159 {offsets = [0, 96], sizes = [1, 32], strides = [1, 1]} : vector<1x128xf32> to vector<1x32xf32>
    %165 = arith.mulf %162, %128 : vector<1x32xf32>
    %166 = arith.mulf %161, %163 : vector<1x32xf32>
    %167 = arith.addf %165, %166 : vector<1x32xf32>
    %168 = math.tanh %167 : vector<1x32xf32>
    %169 = arith.mulf %164, %168 : vector<1x32xf32>
    %c3 = arith.constant 3 : index
    %c0_31 = arith.constant 0 : index
    %170 = vector.load %arg4[%c3, %c0_31] : memref<8x32xf32, #tpu.memory_space<vmem>>, vector<1x32xf32>
    tpu.vector_store %arg4[%c3, %c0_31], %169 {strides = array<i32>} : memref<8x32xf32, #tpu.memory_space<vmem>>, vector<1x32xf32>,
    %171 = vector.extract_strided_slice %12 {offsets = [4, 0], sizes = [1, 128], strides = [1, 1]} : vector<8x128xf32> to vector<1x128xf32>
    %172 = arith.addf %171, %150 : vector<1x128xf32>
    %173 = arith.negf %172 : vector<1x128xf32>
    %174 = math.exp %173 : vector<1x128xf32>
    %cst_32 = arith.constant 1.000000e+00 : f32
    %175 = vector.broadcast %cst_32 : f32 to vector<1x128xf32>
    %176 = arith.addf %175, %174 : vector<1x128xf32>
    %177 = arith.divf %175, %176 : vector<1x128xf32>
    %178 = math.tanh %172 : vector<1x128xf32>
    %179 = vector.extract_strided_slice %177 {offsets = [0, 0], sizes = [1, 32], strides = [1, 1]} : vector<1x128xf32> to vector<1x32xf32>
    %180 = vector.extract_strided_slice %177 {offsets = [0, 32], sizes = [1, 32], strides = [1, 1]} : vector<1x128xf32> to vector<1x32xf32>
    %181 = vector.extract_strided_slice %178 {offsets = [0, 64], sizes = [1, 32], strides = [1, 1]} : vector<1x128xf32> to vector<1x32xf32>
    %182 = vector.extract_strided_slice %177 {offsets = [0, 96], sizes = [1, 32], strides = [1, 1]} : vector<1x128xf32> to vector<1x32xf32>
    %183 = arith.mulf %180, %146 : vector<1x32xf32>
    %184 = arith.mulf %179, %181 : vector<1x32xf32>
    %185 = arith.addf %183, %184 : vector<1x32xf32>
    %186 = math.tanh %185 : vector<1x32xf32>
    %187 = arith.mulf %182, %186 : vector<1x32xf32>
    %cst_33 = arith.constant dense<0.000000e+00> : vector<1x256xf32>
    %188 = tpu.matmul %187, %8, %cst_33 {dimension_numbers = #tpu.dot_dimension_numbers<[1], [0], [0], [1], [0, 0, 1, 1], [], []>} : vector<1x32xf32>, vector<32x256xf32>, vector<1x256xf32> -> vector<1x256xf32>
    %189 = vector.extract_strided_slice %188 {offsets = [0, 0], sizes = [1, 128], strides = [1, 1]} : vector<1x256xf32> to vector<1x128xf32>
    %190 = vector.extract_strided_slice %188 {offsets = [0, 128], sizes = [1, 128], strides = [1, 1]} : vector<1x256xf32> to vector<1x128xf32>
    %cst_34 = arith.constant dense<0.000000e+00> : vector<1x128xf32>
    %191 = tpu.matmul %169, %1, %cst_34 {dimension_numbers = #tpu.dot_dimension_numbers<[1], [0], [0], [1], [0, 0, 1, 1], [], []>} : vector<1x32xf32>, vector<32x128xf32>, vector<1x128xf32> -> vector<1x128xf32>
    %192 = arith.addf %190, %191 : vector<1x128xf32>
    %193 = arith.addf %192, %6 : vector<1x128xf32>
    %194 = arith.negf %193 : vector<1x128xf32>
    %195 = math.exp %194 : vector<1x128xf32>
    %cst_35 = arith.constant 1.000000e+00 : f32
    %196 = vector.broadcast %cst_35 : f32 to vector<1x128xf32>
    %197 = arith.addf %196, %195 : vector<1x128xf32>
    %198 = arith.divf %196, %197 : vector<1x128xf32>
    %199 = math.tanh %193 : vector<1x128xf32>
    %200 = vector.extract_strided_slice %198 {offsets = [0, 0], sizes = [1, 32], strides = [1, 1]} : vector<1x128xf32> to vector<1x32xf32>
    %201 = vector.extract_strided_slice %198 {offsets = [0, 32], sizes = [1, 32], strides = [1, 1]} : vector<1x128xf32> to vector<1x32xf32>
    %202 = vector.extract_strided_slice %199 {offsets = [0, 64], sizes = [1, 32], strides = [1, 1]} : vector<1x128xf32> to vector<1x32xf32>
    %203 = vector.extract_strided_slice %198 {offsets = [0, 96], sizes = [1, 32], strides = [1, 1]} : vector<1x128xf32> to vector<1x32xf32>
    %204 = arith.mulf %201, %167 : vector<1x32xf32>
    %205 = arith.mulf %200, %202 : vector<1x32xf32>
    %206 = arith.addf %204, %205 : vector<1x32xf32>
    %207 = math.tanh %206 : vector<1x32xf32>
    %208 = arith.mulf %203, %207 : vector<1x32xf32>
    %c4 = arith.constant 4 : index
    %c0_36 = arith.constant 0 : index
    %209 = vector.load %arg4[%c4, %c0_36] : memref<8x32xf32, #tpu.memory_space<vmem>>, vector<1x32xf32>
    tpu.vector_store %arg4[%c4, %c0_36], %208 {strides = array<i32>} : memref<8x32xf32, #tpu.memory_space<vmem>>, vector<1x32xf32>,
    %210 = vector.extract_strided_slice %12 {offsets = [5, 0], sizes = [1, 128], strides = [1, 1]} : vector<8x128xf32> to vector<1x128xf32>
    %211 = arith.addf %210, %189 : vector<1x128xf32>
    %212 = arith.negf %211 : vector<1x128xf32>
    %213 = math.exp %212 : vector<1x128xf32>
    %cst_37 = arith.constant 1.000000e+00 : f32
    %214 = vector.broadcast %cst_37 : f32 to vector<1x128xf32>
    %215 = arith.addf %214, %213 : vector<1x128xf32>
    %216 = arith.divf %214, %215 : vector<1x128xf32>
    %217 = math.tanh %211 : vector<1x128xf32>
    %218 = vector.extract_strided_slice %216 {offsets = [0, 0], sizes = [1, 32], strides = [1, 1]} : vector<1x128xf32> to vector<1x32xf32>
    %219 = vector.extract_strided_slice %216 {offsets = [0, 32], sizes = [1, 32], strides = [1, 1]} : vector<1x128xf32> to vector<1x32xf32>
    %220 = vector.extract_strided_slice %217 {offsets = [0, 64], sizes = [1, 32], strides = [1, 1]} : vector<1x128xf32> to vector<1x32xf32>
    %221 = vector.extract_strided_slice %216 {offsets = [0, 96], sizes = [1, 32], strides = [1, 1]} : vector<1x128xf32> to vector<1x32xf32>
    %222 = arith.mulf %219, %185 : vector<1x32xf32>
    %223 = arith.mulf %218, %220 : vector<1x32xf32>
    %224 = arith.addf %222, %223 : vector<1x32xf32>
    %225 = math.tanh %224 : vector<1x32xf32>
    %226 = arith.mulf %221, %225 : vector<1x32xf32>
    %cst_38 = arith.constant dense<0.000000e+00> : vector<1x256xf32>
    %227 = tpu.matmul %226, %8, %cst_38 {dimension_numbers = #tpu.dot_dimension_numbers<[1], [0], [0], [1], [0, 0, 1, 1], [], []>} : vector<1x32xf32>, vector<32x256xf32>, vector<1x256xf32> -> vector<1x256xf32>
    %228 = vector.extract_strided_slice %227 {offsets = [0, 0], sizes = [1, 128], strides = [1, 1]} : vector<1x256xf32> to vector<1x128xf32>
    %229 = vector.extract_strided_slice %227 {offsets = [0, 128], sizes = [1, 128], strides = [1, 1]} : vector<1x256xf32> to vector<1x128xf32>
    %cst_39 = arith.constant dense<0.000000e+00> : vector<1x128xf32>
    %230 = tpu.matmul %208, %1, %cst_39 {dimension_numbers = #tpu.dot_dimension_numbers<[1], [0], [0], [1], [0, 0, 1, 1], [], []>} : vector<1x32xf32>, vector<32x128xf32>, vector<1x128xf32> -> vector<1x128xf32>
    %231 = arith.addf %229, %230 : vector<1x128xf32>
    %232 = arith.addf %231, %6 : vector<1x128xf32>
    %233 = arith.negf %232 : vector<1x128xf32>
    %234 = math.exp %233 : vector<1x128xf32>
    %cst_40 = arith.constant 1.000000e+00 : f32
    %235 = vector.broadcast %cst_40 : f32 to vector<1x128xf32>
    %236 = arith.addf %235, %234 : vector<1x128xf32>
    %237 = arith.divf %235, %236 : vector<1x128xf32>
    %238 = math.tanh %232 : vector<1x128xf32>
    %239 = vector.extract_strided_slice %237 {offsets = [0, 0], sizes = [1, 32], strides = [1, 1]} : vector<1x128xf32> to vector<1x32xf32>
    %240 = vector.extract_strided_slice %237 {offsets = [0, 32], sizes = [1, 32], strides = [1, 1]} : vector<1x128xf32> to vector<1x32xf32>
    %241 = vector.extract_strided_slice %238 {offsets = [0, 64], sizes = [1, 32], strides = [1, 1]} : vector<1x128xf32> to vector<1x32xf32>
    %242 = vector.extract_strided_slice %237 {offsets = [0, 96], sizes = [1, 32], strides = [1, 1]} : vector<1x128xf32> to vector<1x32xf32>
    %243 = arith.mulf %240, %206 : vector<1x32xf32>
    %244 = arith.mulf %239, %241 : vector<1x32xf32>
    %245 = arith.addf %243, %244 : vector<1x32xf32>
    %246 = math.tanh %245 : vector<1x32xf32>
    %247 = arith.mulf %242, %246 : vector<1x32xf32>
    %c5 = arith.constant 5 : index
    %c0_41 = arith.constant 0 : index
    %248 = vector.load %arg4[%c5, %c0_41] : memref<8x32xf32, #tpu.memory_space<vmem>>, vector<1x32xf32>
    tpu.vector_store %arg4[%c5, %c0_41], %247 {strides = array<i32>} : memref<8x32xf32, #tpu.memory_space<vmem>>, vector<1x32xf32>,
    %249 = vector.extract_strided_slice %12 {offsets = [6, 0], sizes = [1, 128], strides = [1, 1]} : vector<8x128xf32> to vector<1x128xf32>
    %250 = arith.addf %249, %228 : vector<1x128xf32>
    %251 = arith.negf %250 : vector<1x128xf32>
    %252 = math.exp %251 : vector<1x128xf32>
    %cst_42 = arith.constant 1.000000e+00 : f32
    %253 = vector.broadcast %cst_42 : f32 to vector<1x128xf32>
    %254 = arith.addf %253, %252 : vector<1x128xf32>
    %255 = arith.divf %253, %254 : vector<1x128xf32>
    %256 = math.tanh %250 : vector<1x128xf32>
    %257 = vector.extract_strided_slice %255 {offsets = [0, 0], sizes = [1, 32], strides = [1, 1]} : vector<1x128xf32> to vector<1x32xf32>
    %258 = vector.extract_strided_slice %255 {offsets = [0, 32], sizes = [1, 32], strides = [1, 1]} : vector<1x128xf32> to vector<1x32xf32>
    %259 = vector.extract_strided_slice %256 {offsets = [0, 64], sizes = [1, 32], strides = [1, 1]} : vector<1x128xf32> to vector<1x32xf32>
    %260 = vector.extract_strided_slice %255 {offsets = [0, 96], sizes = [1, 32], strides = [1, 1]} : vector<1x128xf32> to vector<1x32xf32>
    %261 = arith.mulf %258, %224 : vector<1x32xf32>
    %262 = arith.mulf %257, %259 : vector<1x32xf32>
    %263 = arith.addf %261, %262 : vector<1x32xf32>
    %264 = math.tanh %263 : vector<1x32xf32>
    %265 = arith.mulf %260, %264 : vector<1x32xf32>
    %cst_43 = arith.constant dense<0.000000e+00> : vector<1x256xf32>
    %266 = tpu.matmul %265, %8, %cst_43 {dimension_numbers = #tpu.dot_dimension_numbers<[1], [0], [0], [1], [0, 0, 1, 1], [], []>} : vector<1x32xf32>, vector<32x256xf32>, vector<1x256xf32> -> vector<1x256xf32>
    %267 = vector.extract_strided_slice %266 {offsets = [0, 0], sizes = [1, 128], strides = [1, 1]} : vector<1x256xf32> to vector<1x128xf32>
    %268 = vector.extract_strided_slice %266 {offsets = [0, 128], sizes = [1, 128], strides = [1, 1]} : vector<1x256xf32> to vector<1x128xf32>
    %cst_44 = arith.constant dense<0.000000e+00> : vector<1x128xf32>
    %269 = tpu.matmul %247, %1, %cst_44 {dimension_numbers = #tpu.dot_dimension_numbers<[1], [0], [0], [1], [0, 0, 1, 1], [], []>} : vector<1x32xf32>, vector<32x128xf32>, vector<1x128xf32> -> vector<1x128xf32>
    %270 = arith.addf %268, %269 : vector<1x128xf32>
    %271 = arith.addf %270, %6 : vector<1x128xf32>
    %272 = arith.negf %271 : vector<1x128xf32>
    %273 = math.exp %272 : vector<1x128xf32>
    %cst_45 = arith.constant 1.000000e+00 : f32
    %274 = vector.broadcast %cst_45 : f32 to vector<1x128xf32>
    %275 = arith.addf %274, %273 : vector<1x128xf32>
    %276 = arith.divf %274, %275 : vector<1x128xf32>
    %277 = math.tanh %271 : vector<1x128xf32>
    %278 = vector.extract_strided_slice %276 {offsets = [0, 0], sizes = [1, 32], strides = [1, 1]} : vector<1x128xf32> to vector<1x32xf32>
    %279 = vector.extract_strided_slice %276 {offsets = [0, 32], sizes = [1, 32], strides = [1, 1]} : vector<1x128xf32> to vector<1x32xf32>
    %280 = vector.extract_strided_slice %277 {offsets = [0, 64], sizes = [1, 32], strides = [1, 1]} : vector<1x128xf32> to vector<1x32xf32>
    %281 = vector.extract_strided_slice %276 {offsets = [0, 96], sizes = [1, 32], strides = [1, 1]} : vector<1x128xf32> to vector<1x32xf32>
    %282 = arith.mulf %279, %245 : vector<1x32xf32>
    %283 = arith.mulf %278, %280 : vector<1x32xf32>
    %284 = arith.addf %282, %283 : vector<1x32xf32>
    %285 = math.tanh %284 : vector<1x32xf32>
    %286 = arith.mulf %281, %285 : vector<1x32xf32>
    %c6 = arith.constant 6 : index
    %c0_46 = arith.constant 0 : index
    %287 = vector.load %arg4[%c6, %c0_46] : memref<8x32xf32, #tpu.memory_space<vmem>>, vector<1x32xf32>
    tpu.vector_store %arg4[%c6, %c0_46], %286 {strides = array<i32>} : memref<8x32xf32, #tpu.memory_space<vmem>>, vector<1x32xf32>,
    %288 = vector.extract_strided_slice %12 {offsets = [7, 0], sizes = [1, 128], strides = [1, 1]} : vector<8x128xf32> to vector<1x128xf32>
    %289 = arith.addf %288, %267 : vector<1x128xf32>
    %290 = arith.negf %289 : vector<1x128xf32>
    %291 = math.exp %290 : vector<1x128xf32>
    %cst_47 = arith.constant 1.000000e+00 : f32
    %292 = vector.broadcast %cst_47 : f32 to vector<1x128xf32>
    %293 = arith.addf %292, %291 : vector<1x128xf32>
    %294 = arith.divf %292, %293 : vector<1x128xf32>
    %295 = math.tanh %289 : vector<1x128xf32>
    %296 = vector.extract_strided_slice %294 {offsets = [0, 0], sizes = [1, 32], strides = [1, 1]} : vector<1x128xf32> to vector<1x32xf32>
    %297 = vector.extract_strided_slice %294 {offsets = [0, 32], sizes = [1, 32], strides = [1, 1]} : vector<1x128xf32> to vector<1x32xf32>
    %298 = vector.extract_strided_slice %295 {offsets = [0, 64], sizes = [1, 32], strides = [1, 1]} : vector<1x128xf32> to vector<1x32xf32>
    %299 = vector.extract_strided_slice %294 {offsets = [0, 96], sizes = [1, 32], strides = [1, 1]} : vector<1x128xf32> to vector<1x32xf32>
    %300 = arith.mulf %297, %263 : vector<1x32xf32>
    %301 = arith.mulf %296, %298 : vector<1x32xf32>
    %302 = arith.addf %300, %301 : vector<1x32xf32>
    %303 = math.tanh %302 : vector<1x32xf32>
    %304 = arith.mulf %299, %303 : vector<1x32xf32>
    %cst_48 = arith.constant dense<0.000000e+00> : vector<1x256xf32>
    %305 = tpu.matmul %304, %8, %cst_48 {dimension_numbers = #tpu.dot_dimension_numbers<[1], [0], [0], [1], [0, 0, 1, 1], [], []>} : vector<1x32xf32>, vector<32x256xf32>, vector<1x256xf32> -> vector<1x256xf32>
    %306 = vector.extract_strided_slice %305 {offsets = [0, 128], sizes = [1, 128], strides = [1, 1]} : vector<1x256xf32> to vector<1x128xf32>
    %cst_49 = arith.constant dense<0.000000e+00> : vector<1x128xf32>
    %307 = tpu.matmul %286, %1, %cst_49 {dimension_numbers = #tpu.dot_dimension_numbers<[1], [0], [0], [1], [0, 0, 1, 1], [], []>} : vector<1x32xf32>, vector<32x128xf32>, vector<1x128xf32> -> vector<1x128xf32>
    %308 = arith.addf %306, %307 : vector<1x128xf32>
    %309 = arith.addf %308, %6 : vector<1x128xf32>
    %310 = arith.negf %309 : vector<1x128xf32>
    %311 = math.exp %310 : vector<1x128xf32>
    %cst_50 = arith.constant 1.000000e+00 : f32
    %312 = vector.broadcast %cst_50 : f32 to vector<1x128xf32>
    %313 = arith.addf %312, %311 : vector<1x128xf32>
    %314 = arith.divf %312, %313 : vector<1x128xf32>
    %315 = math.tanh %309 : vector<1x128xf32>
    %316 = vector.extract_strided_slice %314 {offsets = [0, 0], sizes = [1, 32], strides = [1, 1]} : vector<1x128xf32> to vector<1x32xf32>
    %317 = vector.extract_strided_slice %314 {offsets = [0, 32], sizes = [1, 32], strides = [1, 1]} : vector<1x128xf32> to vector<1x32xf32>
    %318 = vector.extract_strided_slice %315 {offsets = [0, 64], sizes = [1, 32], strides = [1, 1]} : vector<1x128xf32> to vector<1x32xf32>
    %319 = vector.extract_strided_slice %314 {offsets = [0, 96], sizes = [1, 32], strides = [1, 1]} : vector<1x128xf32> to vector<1x32xf32>
    %320 = arith.mulf %317, %284 : vector<1x32xf32>
    %321 = arith.mulf %316, %318 : vector<1x32xf32>
    %322 = arith.addf %320, %321 : vector<1x32xf32>
    %323 = math.tanh %322 : vector<1x32xf32>
    %324 = arith.mulf %319, %323 : vector<1x32xf32>
    %c7 = arith.constant 7 : index
    %c0_51 = arith.constant 0 : index
    %325 = vector.load %arg4[%c7, %c0_51] : memref<8x32xf32, #tpu.memory_space<vmem>>, vector<1x32xf32>
    tpu.vector_store %arg4[%c7, %c0_51], %324 {strides = array<i32>} : memref<8x32xf32, #tpu.memory_space<vmem>>, vector<1x32xf32>,
    %c0_52 = arith.constant 0 : index
    %c0_53 = arith.constant 0 : index
    %326 = vector.load %arg4[%c0_52, %c0_53] : memref<8x32xf32, #tpu.memory_space<vmem>>, vector<8x32xf32>
    %cst_54 = arith.constant dense<0.000000e+00> : vector<8x128xf32>
    %327 = tpu.matmul %326, %2, %cst_54 {dimension_numbers = #tpu.dot_dimension_numbers<[1], [0], [0], [1], [0, 0, 1, 1], [], []>} : vector<8x32xf32>, vector<32x128xf32>, vector<8x128xf32> -> vector<8x128xf32>
    %328 = vector.broadcast %7 : vector<1x128xf32> to vector<8x128xf32>
    %329 = arith.addf %327, %328 : vector<8x128xf32>
    %cst_55 = arith.constant dense<0xFF800000> : vector<8xf32>
    %330 = vector.multi_reduction <maximumf>, %329, %cst_55 [1] : vector<8x128xf32> to vector<8xf32>
    %331 = vector.shape_cast %330 : vector<8xf32> to vector<8x1xf32>
    %332 = vector.broadcast %331 : vector<8x1xf32> to vector<8x128xf32>
    %333 = arith.subf %329, %332 : vector<8x128xf32>
    %334 = math.exp %333 : vector<8x128xf32>
    %cst_56 = arith.constant dense<0.000000e+00> : vector<8x128xf32>
    %335 = tpu.matmul %334, %3, %cst_56 {dimension_numbers = #tpu.dot_dimension_numbers<[1], [0], [0], [1], [0, 0, 1, 1], [], []>} : vector<8x128xf32>, vector<128x128xf32>, vector<8x128xf32> -> vector<8x128xf32>
    %336 = tpu.reciprocal %335 {approx = true} : vector<8x128xf32> -> vector<8x128xf32>
    %337 = arith.mulf %335, %336 : vector<8x128xf32>
    %cst_57 = arith.constant 2.000000e+00 : f32
    %338 = vector.broadcast %cst_57 : f32 to vector<8x128xf32>
    %339 = arith.subf %338, %337 : vector<8x128xf32>
    %340 = arith.mulf %336, %339 : vector<8x128xf32>
    %341 = arith.mulf %334, %340 : vector<8x128xf32>
    %c0_58 = arith.constant 0 : index
    %c0_59 = arith.constant 0 : index
    %342 = vector.load %arg3[%c0_58, %c0_59] : memref<8x128xf32, #tpu.memory_space<vmem>>, vector<8x128xf32>
    tpu.vector_store %arg3[%c0_58, %c0_59], %341 {strides = array<i32>} : memref<8x128xf32, #tpu.memory_space<vmem>>, vector<8x128xf32>,
    return
  }
}

</mosaic_0001>

<bundles_post_ra>
// kernel: pattn_forward.1
= control target key start
LH: loop header
LB: loop body
LE: loop exit
PB: predicated region body
PF: predicated region fallthrough
CT: control target
= control target key end

     0   :  { %8 = vsyncpa [#allocation4], 0  ;;  %s1965_s0 = inlined_call_operand.vmem [shape: f32[8,64], index: 0, kind: input, shape index: {}]   ;;  %s1966_s1 = inlined_call_operand.hbm [shape: f32[264,128], index: 1, kind: input, shape index: {}]   ;;  %s1967_s2 = inlined_call_operand.hbm [shape: f32[32,256], index: 2, kind: input, shape index: {}]   ;;  %s1968_s3 = inlined_call_operand.vmem [shape: f32[8,128], index: 3, kind: output, shape index: {}]  }
   0x1   :  { %s16_s14 = sshll.u32 %s1966_s1, 4  ;;  %s17_s14 = int_to_ptr.hbm [resolvable:$true] %s16_s14 }
   0x2   :  { %9 = vsyncpa [#allocation6], 0  ;;  %s1636_s15 = smov [#allocation3]   ;;  %s29_s19 = sshll.u32 %s1967_s2, 4  ;;  %s30_s19 = int_to_ptr.hbm [resolvable:$true] %s29_s19 }
   0x3   :  { %s18_s16 = sshll.u32 %s1636_s15, 4  ;;  %s1637_s20 = smov 128   ;;  %s19_s16 = int_to_ptr.vmem [resolvable:$true] %s18_s16 }
   0x4   :  { %s1638_s21 = smov 8   ;;  %s1639_s22 = smov [#allocation5]  }
   0x5   :  { %24 = dma.hbm_to_vmem [thread:$0]  %s17_s14, 4224, %s19_s16, [#allocation4], %s1637_s20, %s1637_s20, %s1638_s21  }
   0x6   :  { %s31_s23 = sshll.u32 %s1639_s22, 4  ;;  %s1640_s24 = smov 256   ;;  %s32_s23 = int_to_ptr.vmem [resolvable:$true] %s31_s23 }
   0x7   :  { %s1641_s25 = smov 16  }
   0x8   :  { %37 = dma.hbm_to_vmem [thread:$0]  %s30_s19, 1024, %s32_s23, [#allocation6], %s1640_s24, %s1640_s24, %s1641_s25  }
   0x9   :  { %1632 = dma.done.wait [#allocation4], 4224  }
   0xa   :  { %1633 = vsyncadd [#allocation4], 4294963072 }
   0xb   :  { %1634 = dma.done.wait [#allocation6], 1024  }
   0xc   :  { %1635 = vsyncadd [#allocation6], 4294966272  ;;  %v53_v0 = vld [vmem:[#allocation3 + $0x38] sm:$0xff]  ;;  %v52_v1 = vld [vmem:[#allocation3 + $0x30] sm:$0xff]  ;;  %vm89_vm0 = vcmask 523264   ;;  %s1642_s26 = smov 64  }
   0xd   :  { %101 = vmatpush.msra.mxu0 %v53_v0  ;;  %v51_v2 = vld [vmem:[#allocation3 + $0x28] sm:$0xff]  ;;  %v50_v3 = vld [vmem:[#allocation3 + $0x20] sm:$0xff]  ;;  %v49_v4 = vld [vmem:[#allocation3 + $0x18] sm:$0xff]  ;;  %vm154_vm5 = vcmask 261120   ;;  %v1644_v48 = vmov 0.0   ;;  %vm266_vm14 = vcmask 253952  }
   0xe   :  { %v48_v5 = vld [vmem:[#allocation3 + $0x10] sm:$0xff]  ;;  %v47_v6 = vld [vmem:[#allocation3 + $0x8] sm:$0xff]  ;;  %v46_v7 = vld [vmem:[#allocation3] sm:$0xff] }
   0xf   :  { %102 = vmatpush.msra.mxu0 %v52_v1  ;;  %v87_v8 = vld [vmem:[%s1965_s0] sm:$0xff]  ;;  %v1674_v9 = vld [vmem:[#allocation3 + $0x100] sm:$0xff]  ;;  %s1643_s0 = smov 32   ;;  %v1691_v35 = vld [vmem:[#allocation5 + $0x20] sm:$0xff] }
  0x10   :  { %v88_v10 = vperm.slane %v1674_v9, 0  ;;  %v1687_v33 = vld [vmem:[#allocation5 + $0x30] sm:$0xff]  ;;  %v1689_v34 = vld [vmem:[#allocation5 + $0x38] sm:$0xff]  ;;  %v1695_v36 = vld [vmem:[#allocation5 + $0x28] sm:$0xff]  ;;  %v1761_v54 = vrot.slane %v1674_v9, 1 }
  0x11   :  { %103 = vmatpush.msra.mxu0 %v51_v2  ;;  %169 = vmatpush.msra.mxu1 %v1687_v33  ;;  %v1697_v37 = vld [vmem:[#allocation5 + $0x10] sm:$0xff]  ;;  %v1699_v38 = vld [vmem:[#allocation5 + $0x18] sm:$0xff]  ;;  %v1704_v39 = vld [vmem:[#allocation5] sm:$0xff] }
  0x12   :  { %189 = vmatpush.msra.mxu3 %v1689_v34  ;;  %v1706_v40 = vld [vmem:[#allocation5 + $0x8] sm:$0xff]  ;;  %v1724_v43 = vld [vmem:[#allocation3 + $0x58] sm:$0xff]  ;;  %v1730_v45 = vld [vmem:[#allocation3 + $0x48] sm:$0xff] }
  0x13   :  { %104 = vmatpush.msra.mxu0 %v50_v3  ;;  %170 = vmatpush.msra.mxu1 %v1691_v35  ;;  %v1726_v44 = vld [vmem:[#allocation3 + $0x50] sm:$0xff]  ;;  %v1734_v46 = vld [vmem:[#allocation3 + $0x40] sm:$0xff] }
  0x14   :  { %190 = vmatpush.msra.mxu3 %v1695_v36  ;;  %528 = vmatpush.msra.mxu2 %v1724_v43 }
  0x15   :  { %105 = vmatpush.msra.mxu0 %v49_v4  ;;  %171 = vmatpush.msra.mxu1 %v1697_v37 }
  0x16   :  { %191 = vmatpush.msra.mxu3 %v1699_v38  ;;  %529 = vmatpush.msra.mxu2 %v1726_v44 }
  0x17   :  { %106 = vmatpush.msra.mxu0 %v48_v5  ;;  %172 = vmatpush.msra.mxu1 %v1704_v39 }
  0x18   :  { %192 = vmatpush.msra.mxu3 %v1706_v40  ;;  %530 = vmatpush.msra.mxu2 %v1730_v45 }
  0x19   :  { %107 = vmatpush.msra.mxu0 %v47_v6  ;;  %330 = vmatpush.msrb.mxu1 %v1687_v33 }
  0x1a   :  { %212 = vmatpush.msrb.mxu3 %v1724_v43  ;;  %531 = vmatpush.msra.mxu2 %v1734_v46 }
  0x1b   :  { %108 = vmatpush.msra.mxu0 %v46_v7  ;;  %331 = vmatpush.msrb.mxu1 %v1691_v35 }
  0x1c   :  { %1402 = vmatmul.msk.f32.vlgmr.msra.gmra.mxu0 %vm89_vm0, %v87_v8  ;;  %213 = vmatpush.msrb.mxu3 %v1726_v44 }
  0x1d   :  { %350 = vmatpush.msrb.mxu0 %v1689_v34  ;;  %332 = vmatpush.msrb.mxu1 %v1697_v37 }
  0x1e   :  { %214 = vmatpush.msrb.mxu3 %v1730_v45  ;;  %798 = vmatpush.msrb.mxu2 %v1687_v33 }
  0x1f   :  { %351 = vmatpush.msrb.mxu0 %v1695_v36  ;;  %333 = vmatpush.msrb.mxu1 %v1704_v39 }
  0x20   :  { %215 = vmatpush.msrb.mxu3 %v1734_v46  ;;  %799 = vmatpush.msrb.mxu2 %v1691_v35 }
  0x21   :  { %352 = vmatpush.msrb.mxu0 %v1699_v38 }
  0x22   :  { %800 = vmatpush.msrb.mxu2 %v1697_v37 }
  0x23   :  { %353 = vmatpush.msrb.mxu0 %v1706_v40 }
  0x24   :  { %801 = vmatpush.msrb.mxu2 %v1704_v39 }
  0x25   :  { %486 = vmatpush.msra.mxu0 %v1687_v33 }
  0x27   :  { %487 = vmatpush.msra.mxu0 %v1691_v35 }
  0x29   :  { %488 = vmatpush.msra.mxu0 %v1697_v37 }
  0x2b   :  { %489 = vmatpush.msra.mxu0 %v1704_v39 }
  0x99   :  { %v110_v11 = vpop.f32.mrf.mxu0 }
  0x9a   :  { %v1677_v12 = vadd.f32 %v110_v11, %v88_v10 }
  0x9c   :  { %1451 = vtanh.f32 %v1677_v12  ;;  %v1403_v14 = vmul.f32 -1.442695, %v1677_v12 }
  0x9e   :  { %1453 = vpow2.f32 %v1403_v14 }
  0xa2   :  { %v1452_v13 = vpop.eup %1451 }
  0xa3   :  { %136 = vrot.lane.b32.xlu0 %v1452_v13, %s1642_s26 }
  0xa4   :  { %v1454_v15 = vpop.eup %1453 }
  0xa5   :  { %v117_v16 = vadd.f32 1.0, %v1454_v15 }
  0xa7   :  { %1455 = vrcp.f32 %v117_v16  ;;  %v129_v22 = vand.u32 2147483648, %v117_v16  ;;  %vm123_vm2 = vweird.f32 %v117_v16  ;;  %v127_v23 = vand.u32 2147483647, %v117_v16 }
  0xa9   :  { %v130_v25 = vor.u32 1.1754944e-38, %v129_v22  ;;  %vm128_vm4 = vcmp.eq.f32.partialorder %v127_v23, 8.507059e+37 }
  0xad   :  { %v1456_v17 = vpop.eup %1455 }
  0xae   :  { %v119_v18 = vmul.f32 %v1456_v17, %v117_v16  ;;  %vm124_vm1 = vweird.f32 %v1456_v17 }
  0xaf   :  { %vm125_vm3 = vmor %vm123_vm2, %vm124_vm1 }
  0xb0   :  { %v120_v19 = vsub.f32 1.0, %v119_v18 }
  0xb2   :  { %v121_v20 = vmul.f32 %v1456_v17, %v120_v19 }
  0xb4   :  { %v122_v21 = vadd.f32 %v1456_v17, %v121_v20 }
  0xb6   :  { %v126_v24 = vsel %vm125_vm3, %v1456_v17, %v122_v21 }
  0xb7   :  { %v131_v27 = vsel %vm128_vm4, %v130_v25, %v126_v24 }
  0xb8   :  { %v134_v29 = vmul.f32 0.0, %v131_v27 }
 0x115   :  { %v137_v26 = vpop.permute.xlu0 %136 }
 0x116   :  { %v139_v28 = vmul.f32 %v137_v26, %v131_v27 }
 0x118   :  { %141 = vrot.lane.b32.xlu0 %v139_v28, %s1643_s0 }
 0x18a   :  { %v142_v30 = vpop.permute.xlu0 %141 }
 0x18b   :  { %v1683_v31 = vadd.f32 %v142_v30, %v134_v29 }
 0x18d   :  { %1457 = vtanh.f32 %v1683_v31  ;;  %v293_v26 = vrot.slane %v1683_v31, 7 }
 0x193   :  { %v1458_v32 = vpop.eup %1457 }
 0x194   :  { %147 = vrot.lane.b32.xlu1 %v1458_v32, %s1642_s26 }
 0x206   :  { %v148_v41 = vpop.permute.xlu1 %147 }
 0x207   :  { %v150_v42 = vmul.f32 %v148_v41, %v131_v27 }
 0x209   :  { %152 = vrot.lane.b32.xlu1 %v150_v42, %s1643_s0 }
 0x27b   :  { %v153_v47 = vpop.permute.xlu1 %152 }
 0x27c   :  { %1404 = vmatmul.msk.f32.vlgmr.msra.gmra.mxu1 %vm154_vm5, %v153_v47  ;;  %1405 = vmatmul.msk.f32.vlgmr.msra.gmra.mxu3 %vm154_vm5, %v153_v47 }
 0x27d   :  { %372 = vmatpush.msra.mxu3 %v1724_v43  ;;  %506 = vmatpush.msra.mxu1 %v1689_v34 }
 0x27f   :  { %373 = vmatpush.msra.mxu3 %v1726_v44  ;;  %507 = vmatpush.msra.mxu1 %v1695_v36 }
 0x281   :  { %374 = vmatpush.msra.mxu3 %v1730_v45  ;;  %508 = vmatpush.msra.mxu1 %v1699_v38 }
 0x283   :  { %375 = vmatpush.msra.mxu3 %v1734_v46  ;;  %509 = vmatpush.msra.mxu1 %v1706_v40 }
 0x284   :  { %216 = vmatmul.f32.vlgmr.msrb.gmra.mxu3 %v1644_v48 }
 0x285   :  { %642 = vmatpush.msrb.mxu3 %v1687_v33 }
 0x287   :  { %643 = vmatpush.msrb.mxu3 %v1691_v35 }
 0x289   :  { %644 = vmatpush.msrb.mxu3 %v1697_v37 }
 0x28b   :  { %645 = vmatpush.msrb.mxu3 %v1704_v39 }
 0x2f9   :  { %v174_v49 = vpop.f32.mrf.mxu1 }
 0x2fa   :  { %v269_v50 = vrot.slane %v174_v49, 7 }
 0x2fc   :  { %v271_v51 = vadd.f32 %v269_v50, %v1677_v12 }
 0x2fe   :  { %1459 = vtanh.f32 %v271_v51  ;;  %v1407_v59 = vmul.f32 -1.442695, %v271_v51 }
 0x2ff   :  { %v194_v52 = vpop.f32.mrf.mxu3 }
 0x304   :  { %v1460_v53 = vpop.eup %1459 }
 0x305   :  { %297 = vrot.lane.b32.xlu2 %v1460_v53, %s1642_s26 }
 0x307   :  { %v217_v55 = vpop.f32.mrf.mxu3 }
 0x308   :  { %v220_v56 = vadd.f32 %v217_v55, %v194_v52 }
 0x30a   :  { %v224_v57 = vadd.f32 %v1761_v54, %v220_v56 }
 0x30c   :  { %1461 = vtanh.f32 %v224_v57  ;;  %v1406_v62 = vmul.f32 -1.442695, %v224_v57 }
 0x30d   :  { %1463 = vpow2.f32 %v1407_v59 }
 0x312   :  { %v1462_v58 = vpop.eup %1461 }
 0x313   :  { %247 = vrot.lane.b32.xlu2 %v1462_v58, %s1642_s26  ;;  %v1464_v60 = vpop.eup %1463 }
 0x314   :  { %v275_v61 = vadd.f32 1.0, %v1464_v60 }
 0x316   :  { %1465 = vrcp.f32 %v275_v61  ;;  %v287_v7 = vand.u32 2147483648, %v275_v61  ;;  %vm281_vm7 = vweird.f32 %v275_v61  ;;  %v285_v8 = vand.u32 2147483647, %v275_v61 }
 0x317   :  { %1467 = vpow2.f32 %v1406_v62 }
 0x318   :  { %v288_v11 = vor.u32 1.1754944e-38, %v287_v7  ;;  %vm286_vm9 = vcmp.eq.f32.partialorder %v285_v8, 8.507059e+37 }
 0x31c   :  { %v1466_v63 = vpop.eup %1465 }
 0x31d   :  { %v1468_v0 = vpop.eup %1467  ;;  %v277_v1 = vmul.f32 %v1466_v63, %v275_v61  ;;  %vm282_vm6 = vweird.f32 %v1466_v63 }
 0x31e   :  { %v228_v2 = vadd.f32 1.0, %v1468_v0  ;;  %vm283_vm8 = vmor %vm281_vm7, %vm282_vm6 }
 0x31f   :  { %v278_v3 = vsub.f32 1.0, %v277_v1 }
 0x320   :  { %1469 = vrcp.f32 %v228_v2  ;;  %v240_v19 = vand.u32 2147483648, %v228_v2  ;;  %vm234_vm11 = vweird.f32 %v228_v2  ;;  %v238_v20 = vand.u32 2147483647, %v228_v2 }
 0x321   :  { %v279_v4 = vmul.f32 %v1466_v63, %v278_v3 }
 0x322   :  { %v241_v22 = vor.u32 1.1754944e-38, %v240_v19  ;;  %vm239_vm13 = vcmp.eq.f32.partialorder %v238_v20, 8.507059e+37 }
 0x323   :  { %v280_v6 = vadd.f32 %v1466_v63, %v279_v4 }
 0x325   :  { %v284_v10 = vsel %vm283_vm8, %v1466_v63, %v280_v6 }
 0x326   :  { %v1470_v5 = vpop.eup %1469  ;;  %v289_v15 = vsel %vm286_vm9, %v288_v11, %v284_v10 }
 0x327   :  { %v230_v9 = vmul.f32 %v1470_v5, %v228_v2  ;;  %vm235_vm10 = vweird.f32 %v1470_v5  ;;  %v295_v27 = vmul.f32 %v293_v26, %v289_v15 }
 0x328   :  { %vm236_vm12 = vmor %vm234_vm11, %vm235_vm10 }
 0x329   :  { %v231_v13 = vsub.f32 1.0, %v230_v9 }
 0x32b   :  { %v232_v17 = vmul.f32 %v1470_v5, %v231_v13 }
 0x32d   :  { %v233_v18 = vadd.f32 %v1470_v5, %v232_v17 }
 0x32f   :  { %v237_v21 = vsel %vm236_vm12, %v1470_v5, %v233_v18 }
 0x330   :  { %v242_v23 = vsel %vm239_vm13, %v241_v22, %v237_v21 }
 0x331   :  { %v245_v32 = vmul.f32 0.0, %v242_v23 }
 0x35f   :  { %v298_v14 = vpop.permute.xlu2 %297 }
 0x360   :  { %v300_v16 = vmul.f32 %v298_v14, %v289_v15 }
 0x362   :  { %302 = vrot.lane.b32.xlu0 %v300_v16, %s1643_s0 }
 0x36d   :  { %v248_v24 = vpop.permute.xlu2 %247 }
 0x36e   :  { %v250_v25 = vmul.f32 %v248_v24, %v242_v23 }
 0x370   :  { %252 = vrot.lane.b32.xlu1 %v250_v25, %s1643_s0 }
 0x3d4   :  { %v303_v28 = vpop.permute.xlu0 %302 }
 0x3d5   :  { %v1768_v29 = vadd.f32 %v303_v28, %v295_v27 }
 0x3d7   :  { %1471 = vtanh.f32 %v1768_v29 }
 0x3dd   :  { %v1472_v30 = vpop.eup %1471 }
 0x3de   :  { %308 = vrot.lane.b32.xlu2 %v1472_v30, %s1642_s26 }
 0x3e2   :  { %v253_v41 = vpop.permute.xlu1 %252 }
 0x3e3   :  { %v1772_v42 = vadd.f32 %v253_v41, %v245_v32  ;;  %v449_v41 = vrot.slane %v1768_v29, 7 }
 0x3e5   :  { %1473 = vtanh.f32 %v1772_v42 }
 0x3eb   :  { %v1474_v47 = vpop.eup %1473 }
 0x3ec   :  { %258 = vrot.lane.b32.xlu0 %v1474_v47, %s1642_s26 }
 0x438   :  { %v309_v48 = vpop.permute.xlu2 %308 }
 0x439   :  { %v311_v31 = vmul.f32 %v309_v48, %v289_v15 }
 0x43b   :  { %v313_v49 = vrot.slane %v311_v31, 1 }
 0x43d   :  { %314 = vrot.lane.b32.xlu1 %v313_v49, %s1643_s0 }
 0x45e   :  { %v259_v50 = vpop.permute.xlu0 %258 }
 0x45f   :  { %v261_v51 = vmul.f32 %v259_v50, %v242_v23 }
 0x461   :  { %263 = vrot.lane.b32.xlu2 %v261_v51, %s1643_s0 }
 0x4af   :  { %v315_v52 = vpop.permute.xlu1 %314 }
 0x4b0   :  { %1408 = vmatmul.msk.f32.vlgmr.msrb.gmra.mxu1 %vm154_vm5, %v315_v52  ;;  %1409 = vmatmul.msk.f32.vlgmr.msrb.gmra.mxu0 %vm154_vm5, %v315_v52 }
 0x4b1   :  { %662 = vmatpush.msrb.mxu0 %v1689_v34  ;;  %684 = vmatpush.msrb.mxu1 %v1724_v43 }
 0x4b3   :  { %663 = vmatpush.msrb.mxu0 %v1695_v36  ;;  %685 = vmatpush.msrb.mxu1 %v1726_v44 }
 0x4b5   :  { %664 = vmatpush.msrb.mxu0 %v1699_v38  ;;  %686 = vmatpush.msrb.mxu1 %v1730_v45 }
 0x4b7   :  { %665 = vmatpush.msrb.mxu0 %v1706_v40  ;;  %687 = vmatpush.msrb.mxu1 %v1734_v46 }
 0x4bb   :  { %v264_v53 = vpop.permute.xlu2 %263 }
 0x4bc   :  { %267 = vst.msk [vmem:[#allocation2] sm:$0x1] %vm266_vm14, %v264_v53  ;;  %1410 = vmatmul.msk.f32.vlgmr.msra.gmra.mxu3 %vm154_vm5, %v264_v53 }
 0x4bd   :  { %818 = vmatpush.msra.mxu3 %v1689_v34 }
 0x4bf   :  { %819 = vmatpush.msra.mxu3 %v1695_v36 }
 0x4c1   :  { %820 = vmatpush.msra.mxu3 %v1699_v38 }
 0x4c3   :  { %821 = vmatpush.msra.mxu3 %v1706_v40 }
 0x52d   :  { %v335_v55 = vpop.f32.mrf.mxu1  ;;  %v355_v59 = vpop.f32.mrf.mxu0 }
 0x52e   :  { %v425_v56 = vrot.slane %v335_v55, 6 }
 0x530   :  { %v427_v57 = vadd.f32 %v425_v56, %v1677_v12 }
 0x532   :  { %1475 = vtanh.f32 %v427_v57  ;;  %v1412_v0 = vmul.f32 -1.442695, %v427_v57 }
 0x538   :  { %v1476_v58 = vpop.eup %1475 }
 0x539   :  { %453 = vrot.lane.b32.xlu0 %v1476_v58, %s1642_s26 }
 0x53f   :  { %v377_v60 = vpop.f32.mrf.mxu3 }
 0x540   :  { %v380_v61 = vadd.f32 %v377_v60, %v355_v59 }
 0x542   :  { %v381_v62 = vadd.f32 %v380_v61, %v1761_v54 }
 0x544   :  { %1477 = vtanh.f32 %v381_v62  ;;  %v1411_v3 = vmul.f32 -1.442695, %v381_v62 }
 0x545   :  { %1479 = vpow2.f32 %v1412_v0 }
 0x54a   :  { %v1478_v63 = vpop.eup %1477 }
 0x54b   :  { %404 = vrot.lane.b32.xlu1 %v1478_v63, %s1642_s26  ;;  %v1480_v1 = vpop.eup %1479 }
 0x54c   :  { %v431_v2 = vadd.f32 1.0, %v1480_v1 }
 0x54e   :  { %1481 = vrcp.f32 %v431_v2  ;;  %v443_v11 = vand.u32 2147483648, %v431_v2  ;;  %vm437_vm0 = vweird.f32 %v431_v2  ;;  %v441_v13 = vand.u32 2147483647, %v431_v2 }
 0x54f   :  { %1483 = vpow2.f32 %v1411_v3 }
 0x550   :  { %v444_v16 = vor.u32 1.1754944e-38, %v443_v11  ;;  %vm442_vm2 = vcmp.eq.f32.partialorder %v441_v13, 8.507059e+37 }
 0x554   :  { %v1482_v4 = vpop.eup %1481 }
 0x555   :  { %v433_v5 = vmul.f32 %v1482_v4, %v431_v2  ;;  %v1484_v6 = vpop.eup %1483  ;;  %vm438_vm15 = vweird.f32 %v1482_v4 }
 0x556   :  { %v385_v8 = vadd.f32 1.0, %v1484_v6  ;;  %vm439_vm1 = vmor %vm437_vm0, %vm438_vm15 }
 0x557   :  { %v434_v7 = vsub.f32 1.0, %v433_v5 }
 0x558   :  { %1485 = vrcp.f32 %v385_v8  ;;  %v397_v24 = vand.u32 2147483648, %v385_v8  ;;  %vm391_vm4 = vweird.f32 %v385_v8  ;;  %v395_v25 = vand.u32 2147483647, %v385_v8 }
 0x559   :  { %v435_v9 = vmul.f32 %v1482_v4, %v434_v7 }
 0x55a   :  { %v398_v27 = vor.u32 1.1754944e-38, %v397_v24  ;;  %vm396_vm7 = vcmp.eq.f32.partialorder %v395_v25, 8.507059e+37 }
 0x55b   :  { %v436_v10 = vadd.f32 %v1482_v4, %v435_v9 }
 0x55d   :  { %v440_v15 = vsel %vm439_vm1, %v1482_v4, %v436_v10 }
 0x55e   :  { %v1486_v14 = vpop.eup %1485  ;;  %v445_v19 = vsel %vm442_vm2, %v444_v16, %v440_v15 }
 0x55f   :  { %v387_v17 = vmul.f32 %v1486_v14, %v385_v8  ;;  %vm392_vm3 = vweird.f32 %v1486_v14  ;;  %v451_v47 = vmul.f32 %v449_v41, %v445_v19 }
 0x560   :  { %vm393_vm6 = vmor %vm391_vm4, %vm392_vm3 }
 0x561   :  { %v388_v21 = vsub.f32 1.0, %v387_v17 }
 0x563   :  { %v389_v22 = vmul.f32 %v1486_v14, %v388_v21 }
 0x565   :  { %v390_v23 = vadd.f32 %v1486_v14, %v389_v22 }
 0x567   :  { %v394_v26 = vsel %vm393_vm6, %v1486_v14, %v390_v23 }
 0x568   :  { %v399_v30 = vsel %vm396_vm7, %v398_v27, %v394_v26 }
 0x569   :  { %v402_v50 = vmul.f32 %v399_v30, %v1772_v42 }
 0x5ab   :  { %v454_v18 = vpop.permute.xlu0 %453 }
 0x5ac   :  { %v456_v20 = vmul.f32 %v454_v18, %v445_v19 }
 0x5ae   :  { %458 = vrot.lane.b32.xlu2 %v456_v20, %s1643_s0 }
 0x5bd   :  { %v405_v28 = vpop.permute.xlu1 %404 }
 0x5be   :  { %v407_v32 = vmul.f32 %v405_v28, %v399_v30 }
 0x5c0   :  { %409 = vrot.lane.b32.xlu0 %v407_v32, %s1643_s0 }
 0x608   :  { %v459_v48 = vpop.permute.xlu2 %458 }
 0x609   :  { %v1801_v31 = vadd.f32 %v459_v48, %v451_v47 }
 0x60b   :  { %1487 = vtanh.f32 %v1801_v31 }
 0x611   :  { %v1488_v49 = vpop.eup %1487 }
 0x612   :  { %464 = vrot.lane.b32.xlu1 %v1488_v49, %s1642_s26 }
 0x632   :  { %v410_v51 = vpop.permute.xlu0 %409 }
 0x633   :  { %v1806_v52 = vadd.f32 %v410_v51, %v402_v50  ;;  %v605_v51 = vrot.slane %v1801_v31, 7 }
 0x635   :  { %1489 = vtanh.f32 %v1806_v52 }
 0x63b   :  { %v1490_v53 = vpop.eup %1489 }
 0x63c   :  { %415 = vrot.lane.b32.xlu2 %v1490_v53, %s1642_s26 }
 0x684   :  { %v465_v29 = vpop.permute.xlu1 %464 }
 0x685   :  { %v467_v55 = vmul.f32 %v465_v29, %v445_v19 }
 0x687   :  { %v469_v56 = vrot.slane %v467_v55, 2 }
 0x689   :  { %470 = vrot.lane.b32.xlu0 %v469_v56, %s1643_s0 }
 0x696   :  { %v416_v57 = vpop.permute.xlu2 %415 }
 0x697   :  { %v418_v58 = vmul.f32 %v416_v57, %v399_v30 }
 0x699   :  { %420 = vrot.lane.b32.xlu1 %v418_v58, %s1643_s0 }
 0x6fb   :  { %v471_v59 = vpop.permute.xlu0 %470 }
 0x6fc   :  { %1413 = vmatmul.msk.f32.vlgmr.msra.gmra.mxu0 %vm154_vm5, %v471_v59  ;;  %1414 = vmatmul.msk.f32.vlgmr.msra.gmra.mxu1 %vm154_vm5, %v471_v59 }
 0x6fd   :  { %840 = vmatpush.msra.mxu0 %v1724_v43  ;;  %954 = vmatpush.msra.mxu1 %v1687_v33 }
 0x6ff   :  { %841 = vmatpush.msra.mxu0 %v1726_v44  ;;  %955 = vmatpush.msra.mxu1 %v1691_v35 }
 0x701   :  { %842 = vmatpush.msra.mxu0 %v1730_v45  ;;  %956 = vmatpush.msra.mxu1 %v1697_v37 }
 0x703   :  { %843 = vmatpush.msra.mxu0 %v1734_v46  ;;  %957 = vmatpush.msra.mxu1 %v1704_v39 }
 0x70b   :  { %v421_v42 = vpop.permute.xlu1 %420 }
 0x70c   :  { %423 = vst.msk [vmem:[#allocation2 + $0x1] sm:$0x1] %vm266_vm14, %v421_v42  ;;  %1415 = vmatmul.msk.f32.vlgmr.msra.gmra.mxu2 %vm154_vm5, %v421_v42 }
 0x70d   :  { %974 = vmatpush.msra.mxu2 %v1689_v34 }
 0x70f   :  { %975 = vmatpush.msra.mxu2 %v1695_v36 }
 0x711   :  { %976 = vmatpush.msra.mxu2 %v1699_v38 }
 0x713   :  { %977 = vmatpush.msra.mxu2 %v1706_v40 }
 0x779   :  { %v491_v60 = vpop.f32.mrf.mxu0  ;;  %v511_v0 = vpop.f32.mrf.mxu1 }
 0x77a   :  { %v581_v61 = vrot.slane %v491_v60, 5 }
 0x77c   :  { %v583_v62 = vadd.f32 %v581_v61, %v1677_v12 }
 0x77e   :  { %1491 = vtanh.f32 %v583_v62  ;;  %v1417_v5 = vmul.f32 -1.442695, %v583_v62 }
 0x784   :  { %v1492_v63 = vpop.eup %1491 }
 0x785   :  { %609 = vrot.lane.b32.xlu2 %v1492_v63, %s1642_s26 }
 0x78f   :  { %v533_v1 = vpop.f32.mrf.mxu2 }
 0x790   :  { %v536_v2 = vadd.f32 %v533_v1, %v511_v0 }
 0x792   :  { %v537_v3 = vadd.f32 %v536_v2, %v1761_v54 }
 0x794   :  { %1493 = vtanh.f32 %v537_v3  ;;  %v1416_v20 = vmul.f32 -1.442695, %v537_v3 }
 0x795   :  { %1495 = vpow2.f32 %v1417_v5 }
 0x79a   :  { %v1494_v4 = vpop.eup %1493 }
 0x79b   :  { %560 = vrot.lane.b32.xlu0 %v1494_v4, %s1642_s26  ;;  %v1496_v6 = vpop.eup %1495 }
 0x79c   :  { %v587_v7 = vadd.f32 1.0, %v1496_v6 }
 0x79e   :  { %1497 = vrcp.f32 %v587_v7  ;;  %v599_v14 = vand.u32 2147483648, %v587_v7  ;;  %vm593_vm9 = vweird.f32 %v587_v7  ;;  %v597_v15 = vand.u32 2147483647, %v587_v7 }
 0x79f   :  { %1499 = vpow2.f32 %v1416_v20 }
 0x7a0   :  { %v600_v17 = vor.u32 1.1754944e-38, %v599_v14  ;;  %vm598_vm11 = vcmp.eq.f32.partialorder %v597_v15, 8.507059e+37 }
 0x7a4   :  { %v1498_v8 = vpop.eup %1497 }
 0x7a5   :  { %v589_v9 = vmul.f32 %v1498_v8, %v587_v7  ;;  %vm594_vm8 = vweird.f32 %v1498_v8  ;;  %v1500_v22 = vpop.eup %1499 }
 0x7a6   :  { %vm595_vm10 = vmor %vm593_vm9, %vm594_vm8  ;;  %v541_v23 = vadd.f32 1.0, %v1500_v22 }
 0x7a7   :  { %v590_v10 = vsub.f32 1.0, %v589_v9 }
 0x7a8   :  { %1501 = vrcp.f32 %v541_v23  ;;  %v553_v30 = vand.u32 2147483648, %v541_v23  ;;  %vm547_vm13 = vweird.f32 %v541_v23  ;;  %v551_v32 = vand.u32 2147483647, %v541_v23 }
 0x7a9   :  { %v591_v11 = vmul.f32 %v1498_v8, %v590_v10 }
 0x7aa   :  { %v554_v47 = vor.u32 1.1754944e-38, %v553_v30  ;;  %vm552_vm0 = vcmp.eq.f32.partialorder %v551_v32, 8.507059e+37 }
 0x7ab   :  { %v592_v13 = vadd.f32 %v1498_v8, %v591_v11 }
 0x7ad   :  { %v596_v16 = vsel %vm595_vm10, %v1498_v8, %v592_v13 }
 0x7ae   :  { %v601_v18 = vsel %vm598_vm11, %v600_v17, %v596_v16  ;;  %v1502_v24 = vpop.eup %1501 }
 0x7af   :  { %v543_v25 = vmul.f32 %v1502_v24, %v541_v23  ;;  %vm548_vm12 = vweird.f32 %v1502_v24  ;;  %v607_v53 = vmul.f32 %v605_v51, %v601_v18 }
 0x7b0   :  { %vm549_vm15 = vmor %vm547_vm13, %vm548_vm12 }
 0x7b1   :  { %v544_v26 = vsub.f32 1.0, %v543_v25 }
 0x7b3   :  { %v545_v27 = vmul.f32 %v1502_v24, %v544_v26 }
 0x7b5   :  { %v546_v28 = vadd.f32 %v1502_v24, %v545_v27 }
 0x7b7   :  { %v550_v41 = vsel %vm549_vm15, %v1502_v24, %v546_v28 }
 0x7b8   :  { %v555_v49 = vsel %vm552_vm0, %v554_v47, %v550_v41 }
 0x7b9   :  { %v558_v57 = vmul.f32 %v555_v49, %v1806_v52 }
 0x7df   :  { %v610_v19 = vpop.permute.xlu2 %609 }
 0x7e0   :  { %v612_v21 = vmul.f32 %v610_v19, %v601_v18 }
 0x7e2   :  { %614 = vrot.lane.b32.xlu1 %v612_v21, %s1643_s0 }
 0x80d   :  { %v561_v48 = vpop.permute.xlu0 %560 }
 0x80e   :  { %v563_v50 = vmul.f32 %v561_v48, %v555_v49 }
 0x810   :  { %565 = vrot.lane.b32.xlu2 %v563_v50, %s1643_s0 }
 0x854   :  { %v615_v29 = vpop.permute.xlu1 %614 }
 0x855   :  { %v1835_v55 = vadd.f32 %v615_v29, %v607_v53 }
 0x857   :  { %1503 = vtanh.f32 %v1835_v55  ;;  %v761_v53 = vrot.slane %v1835_v55, 7 }
 0x85d   :  { %v1504_v56 = vpop.eup %1503 }
 0x85e   :  { %620 = vrot.lane.b32.xlu0 %v1504_v56, %s1642_s26 }
 0x86a   :  { %v566_v58 = vpop.permute.xlu2 %565 }
 0x86b   :  { %v1840_v59 = vadd.f32 %v566_v58, %v558_v57 }
 0x86d   :  { %1505 = vtanh.f32 %v1840_v59 }
 0x873   :  { %v1506_v42 = vpop.eup %1505 }
 0x874   :  { %571 = vrot.lane.b32.xlu1 %v1506_v42, %s1642_s26 }
 0x8d0   :  { %v621_v31 = vpop.permute.xlu0 %620 }
 0x8d1   :  { %v623_v60 = vmul.f32 %v621_v31, %v601_v18 }
 0x8d3   :  { %v625_v61 = vrot.slane %v623_v60, 3 }
 0x8d5   :  { %626 = vrot.lane.b32.xlu2 %v625_v61, %s1643_s0 }
 0x8e6   :  { %v572_v62 = vpop.permute.xlu1 %571 }
 0x8e7   :  { %v574_v63 = vmul.f32 %v572_v62, %v555_v49 }
 0x8e9   :  { %576 = vrot.lane.b32.xlu0 %v574_v63, %s1643_s0 }
 0x92f   :  { %v627_v0 = vpop.permute.xlu2 %626 }
 0x930   :  { %1418 = vmatmul.msk.f32.vlgmr.msrb.gmra.mxu3 %vm154_vm5, %v627_v0  ;;  %1419 = vmatmul.msk.f32.vlgmr.msrb.gmra.mxu0 %vm154_vm5, %v627_v0 }
 0x931   :  { %996 = vmatpush.msrb.mxu3 %v1724_v43  ;;  %1110 = vmatpush.msrb.mxu0 %v1687_v33 }
 0x933   :  { %997 = vmatpush.msrb.mxu3 %v1726_v44  ;;  %1111 = vmatpush.msrb.mxu0 %v1691_v35 }
 0x935   :  { %998 = vmatpush.msrb.mxu3 %v1730_v45  ;;  %1112 = vmatpush.msrb.mxu0 %v1697_v37 }
 0x937   :  { %999 = vmatpush.msrb.mxu3 %v1734_v46  ;;  %1113 = vmatpush.msrb.mxu0 %v1704_v39 }
 0x95b   :  { %v577_v52 = vpop.permute.xlu0 %576 }
 0x95c   :  { %579 = vst.msk [vmem:[#allocation2 + $0x2] sm:$0x1] %vm266_vm14, %v577_v52  ;;  %1420 = vmatmul.msk.f32.vlgmr.msrb.gmra.mxu1 %vm154_vm5, %v577_v52 }
 0x95d   :  { %1130 = vmatpush.msrb.mxu1 %v1689_v34 }
 0x95f   :  { %1131 = vmatpush.msrb.mxu1 %v1695_v36 }
 0x961   :  { %1132 = vmatpush.msrb.mxu1 %v1699_v38 }
 0x963   :  { %1133 = vmatpush.msrb.mxu1 %v1706_v40 }
 0x9ad   :  { %v667_v39 = vpop.f32.mrf.mxu0 }
 0x9b3   :  { %v647_v33 = vpop.f32.mrf.mxu3 }
 0x9b4   :  { %v737_v35 = vrot.slane %v647_v33, 4 }
 0x9b6   :  { %v739_v37 = vadd.f32 %v737_v35, %v1677_v12 }
 0x9b8   :  { %1507 = vtanh.f32 %v739_v37  ;;  %v1422_v6 = vmul.f32 -1.442695, %v739_v37 }
 0x9be   :  { %v1508_v1 = vpop.eup %1507 }
 0x9bf   :  { %765 = vrot.lane.b32.xlu1 %v1508_v1, %s1642_s26 }
 0x9d9   :  { %v689_v2 = vpop.f32.mrf.mxu1 }
 0x9da   :  { %v692_v3 = vadd.f32 %v689_v2, %v667_v39 }
 0x9dc   :  { %v693_v4 = vadd.f32 %v692_v3, %v1761_v54 }
 0x9de   :  { %1509 = vtanh.f32 %v693_v4  ;;  %v1421_v9 = vmul.f32 -1.442695, %v693_v4 }
 0x9df   :  { %1511 = vpow2.f32 %v1422_v6 }
 0x9e4   :  { %v1510_v5 = vpop.eup %1509 }
 0x9e5   :  { %716 = vrot.lane.b32.xlu2 %v1510_v5, %s1642_s26  ;;  %v1512_v7 = vpop.eup %1511 }
 0x9e6   :  { %v743_v8 = vadd.f32 1.0, %v1512_v7 }
 0x9e8   :  { %1513 = vrcp.f32 %v743_v8  ;;  %v755_v19 = vand.u32 2147483648, %v743_v8  ;;  %vm749_vm2 = vweird.f32 %v743_v8  ;;  %v753_v20 = vand.u32 2147483647, %v743_v8 }
 0x9e9   :  { %1515 = vpow2.f32 %v1421_v9 }
 0x9ea   :  { %v756_v23 = vor.u32 1.1754944e-38, %v755_v19  ;;  %vm754_vm4 = vcmp.eq.f32.partialorder %v753_v20, 8.507059e+37 }
 0x9ee   :  { %v1514_v10 = vpop.eup %1513 }
 0x9ef   :  { %v1516_v11 = vpop.eup %1515  ;;  %v745_v13 = vmul.f32 %v1514_v10, %v743_v8  ;;  %vm750_vm1 = vweird.f32 %v1514_v10 }
 0x9f0   :  { %v697_v14 = vadd.f32 1.0, %v1516_v11  ;;  %vm751_vm3 = vmor %vm749_vm2, %vm750_vm1 }
 0x9f1   :  { %v746_v15 = vsub.f32 1.0, %v745_v13 }
 0x9f2   :  { %1517 = vrcp.f32 %v697_v14  ;;  %v709_v32 = vand.u32 2147483648, %v697_v14  ;;  %vm703_vm7 = vweird.f32 %v697_v14  ;;  %v707_v41 = vand.u32 2147483647, %v697_v14 }
 0x9f3   :  { %v747_v16 = vmul.f32 %v1514_v10, %v746_v15 }
 0x9f4   :  { %v710_v48 = vor.u32 1.1754944e-38, %v709_v32  ;;  %vm708_vm9 = vcmp.eq.f32.partialorder %v707_v41, 8.507059e+37 }
 0x9f5   :  { %v748_v18 = vadd.f32 %v1514_v10, %v747_v16 }
 0x9f7   :  { %v752_v22 = vsel %vm751_vm3, %v1514_v10, %v748_v18 }
 0x9f8   :  { %v1518_v17 = vpop.eup %1517  ;;  %v757_v26 = vsel %vm754_vm4, %v756_v23, %v752_v22 }
 0x9f9   :  { %v699_v21 = vmul.f32 %v1518_v17, %v697_v14  ;;  %vm704_vm6 = vweird.f32 %v1518_v17  ;;  %v763_v29 = vmul.f32 %v761_v53, %v757_v26 }
 0x9fa   :  { %vm705_vm8 = vmor %vm703_vm7, %vm704_vm6 }
 0x9fb   :  { %v700_v24 = vsub.f32 1.0, %v699_v21 }
 0x9fd   :  { %v701_v28 = vmul.f32 %v1518_v17, %v700_v24 }
 0x9ff   :  { %v702_v30 = vadd.f32 %v1518_v17, %v701_v28 }
 0xa01   :  { %v706_v47 = vsel %vm705_vm8, %v1518_v17, %v702_v30 }
 0xa02   :  { %v711_v50 = vsel %vm708_vm9, %v710_v48, %v706_v47 }
 0xa03   :  { %v714_v42 = vmul.f32 %v711_v50, %v1840_v59 }
 0xa31   :  { %v766_v25 = vpop.permute.xlu1 %765 }
 0xa32   :  { %v768_v27 = vmul.f32 %v766_v25, %v757_v26 }
 0xa34   :  { %770 = vrot.lane.b32.xlu0 %v768_v27, %s1643_s0 }
 0xa3f   :  { %v717_v49 = vpop.permute.xlu2 %716 }
 0xa40   :  { %v719_v51 = vmul.f32 %v717_v49, %v711_v50 }
 0xa42   :  { %721 = vrot.lane.b32.xlu1 %v719_v51, %s1643_s0 }
 0xaa6   :  { %v771_v56 = vpop.permute.xlu0 %770 }
 0xaa7   :  { %v1869_v57 = vadd.f32 %v771_v56, %v763_v29 }
 0xaa9   :  { %1519 = vtanh.f32 %v1869_v57  ;;  %v917_v32 = vrot.slane %v1869_v57, 7 }
 0xaaf   :  { %v1520_v58 = vpop.eup %1519 }
 0xab0   :  { %776 = vrot.lane.b32.xlu2 %v1520_v58, %s1642_s26 }
 0xab4   :  { %v722_v31 = vpop.permute.xlu1 %721 }
 0xab5   :  { %v1874_v60 = vadd.f32 %v722_v31, %v714_v42 }
 0xab7   :  { %1521 = vtanh.f32 %v1874_v60 }
 0xabd   :  { %v1522_v61 = vpop.eup %1521 }
 0xabe   :  { %727 = vrot.lane.b32.xlu0 %v1522_v61, %s1642_s26 }
 0xb0a   :  { %v777_v55 = vpop.permute.xlu2 %776 }
 0xb0b   :  { %v779_v62 = vmul.f32 %v777_v55, %v757_v26 }
 0xb0d   :  { %v781_v63 = vrot.slane %v779_v62, 4 }
 0xb0f   :  { %782 = vrot.lane.b32.xlu1 %v781_v63, %s1643_s0 }
 0xb30   :  { %v728_v0 = vpop.permute.xlu0 %727 }
 0xb31   :  { %v730_v52 = vmul.f32 %v728_v0, %v711_v50 }
 0xb33   :  { %732 = vrot.lane.b32.xlu2 %v730_v52, %s1643_s0 }
 0xb81   :  { %v783_v33 = vpop.permute.xlu1 %782 }
 0xb82   :  { %1423 = vmatmul.msk.f32.vlgmr.msrb.gmra.mxu2 %vm154_vm5, %v783_v33  ;;  %1424 = vmatmul.msk.f32.vlgmr.msra.gmra.mxu3 %vm154_vm5, %v783_v33 }
 0xb83   :  { %1152 = vmatpush.msrb.mxu2 %v1724_v43  ;;  %1266 = vmatpush.msra.mxu3 %v1689_v34 }
 0xb85   :  { %1153 = vmatpush.msrb.mxu2 %v1726_v44  ;;  %1267 = vmatpush.msra.mxu3 %v1695_v36 }
 0xb87   :  { %1154 = vmatpush.msrb.mxu2 %v1730_v45  ;;  %1268 = vmatpush.msra.mxu3 %v1699_v38 }
 0xb89   :  { %1155 = vmatpush.msrb.mxu2 %v1734_v46  ;;  %1269 = vmatpush.msra.mxu3 %v1706_v40 }
 0xb8d   :  { %v733_v59 = vpop.permute.xlu2 %732 }
 0xb8e   :  { %735 = vst.msk [vmem:[#allocation2 + $0x3] sm:$0x1] %vm266_vm14, %v733_v59  ;;  %1425 = vmatmul.msk.f32.vlgmr.msra.gmra.mxu0 %vm154_vm5, %v733_v59 }
 0xb8f   :  { %1288 = vmatpush.msra.mxu0 %v1724_v43 }
 0xb91   :  { %1289 = vmatpush.msra.mxu0 %v1726_v44 }
 0xb93   :  { %1290 = vmatpush.msra.mxu0 %v1730_v45 }
 0xb95   :  { %1291 = vmatpush.msra.mxu0 %v1734_v46 }
 0xc05   :  { %v803_v34 = vpop.f32.mrf.mxu2  ;;  %v823_v35 = vpop.f32.mrf.mxu3 }
 0xc06   :  { %v893_v36 = vrot.slane %v803_v34, 3 }
 0xc08   :  { %v895_v38 = vadd.f32 %v893_v36, %v1677_v12 }
 0xc0a   :  { %1523 = vtanh.f32 %v895_v38  ;;  %v1427_v44 = vmul.f32 -1.442695, %v895_v38 }
 0xc0b   :  { %v845_v40 = vpop.f32.mrf.mxu0 }
 0xc0c   :  { %v848_v37 = vadd.f32 %v845_v40, %v823_v35 }
 0xc0e   :  { %v849_v1 = vadd.f32 %v848_v37, %v1761_v54 }
 0xc10   :  { %v1524_v39 = vpop.eup %1523  ;;  %1525 = vtanh.f32 %v849_v1  ;;  %v1426_v45 = vmul.f32 -1.442695, %v849_v1 }
 0xc11   :  { %921 = vrot.lane.b32.xlu0 %v1524_v39, %s1642_s26  ;;  %1527 = vpow2.f32 %v1427_v44 }
 0xc12   :  { %1529 = vpow2.f32 %v1426_v45 }
 0xc16   :  { %v1526_v43 = vpop.eup %1525 }
 0xc17   :  { %872 = vrot.lane.b32.xlu1 %v1526_v43, %s1642_s26  ;;  %v1528_v46 = vpop.eup %1527 }
 0xc18   :  { %v899_v2 = vadd.f32 1.0, %v1528_v46  ;;  %v1530_v3 = vpop.eup %1529 }
 0xc19   :  { %v853_v4 = vadd.f32 1.0, %v1530_v3 }
 0xc1a   :  { %1531 = vrcp.f32 %v899_v2  ;;  %v911_v14 = vand.u32 2147483648, %v899_v2  ;;  %vm905_vm11 = vweird.f32 %v899_v2  ;;  %v909_v15 = vand.u32 2147483647, %v899_v2 }
 0xc1b   :  { %1533 = vrcp.f32 %v853_v4  ;;  %v865_v22 = vand.u32 2147483648, %v853_v4  ;;  %vm859_vm0 = vweird.f32 %v853_v4  ;;  %v863_v24 = vand.u32 2147483647, %v853_v4 }
 0xc1c   :  { %v912_v18 = vor.u32 1.1754944e-38, %v911_v14  ;;  %vm910_vm13 = vcmp.eq.f32.partialorder %v909_v15, 8.507059e+37 }
 0xc1d   :  { %v866_v26 = vor.u32 1.1754944e-38, %v865_v22  ;;  %vm864_vm2 = vcmp.eq.f32.partialorder %v863_v24, 8.507059e+37 }
 0xc20   :  { %v1532_v5 = vpop.eup %1531 }
 0xc21   :  { %v901_v6 = vmul.f32 %v1532_v5, %v899_v2  ;;  %v1534_v7 = vpop.eup %1533  ;;  %vm906_vm10 = vweird.f32 %v1532_v5 }
 0xc22   :  { %v855_v9 = vmul.f32 %v1534_v7, %v853_v4  ;;  %vm907_vm12 = vmor %vm905_vm11, %vm906_vm10  ;;  %vm860_vm15 = vweird.f32 %v1534_v7 }
 0xc23   :  { %v902_v8 = vsub.f32 1.0, %v901_v6  ;;  %vm861_vm1 = vmor %vm859_vm0, %vm860_vm15 }
 0xc24   :  { %v856_v11 = vsub.f32 1.0, %v855_v9 }
 0xc25   :  { %v903_v10 = vmul.f32 %v1532_v5, %v902_v8 }
 0xc26   :  { %v857_v16 = vmul.f32 %v1534_v7, %v856_v11 }
 0xc27   :  { %v904_v13 = vadd.f32 %v1532_v5, %v903_v10 }
 0xc28   :  { %v858_v19 = vadd.f32 %v1534_v7, %v857_v16 }
 0xc29   :  { %v908_v17 = vsel %vm907_vm12, %v1532_v5, %v904_v13 }
 0xc2a   :  { %v913_v21 = vsel %vm910_vm13, %v912_v18, %v908_v17  ;;  %v862_v25 = vsel %vm861_vm1, %v1534_v7, %v858_v19 }
 0xc2b   :  { %v867_v28 = vsel %vm864_vm2, %v866_v26, %v862_v25  ;;  %v919_v41 = vmul.f32 %v917_v32, %v913_v21 }
 0xc2c   :  { %v870_v50 = vmul.f32 %v867_v28, %v1874_v60 }
 0xc83   :  { %v922_v20 = vpop.permute.xlu0 %921 }
 0xc84   :  { %v924_v23 = vmul.f32 %v922_v20, %v913_v21 }
 0xc86   :  { %926 = vrot.lane.b32.xlu2 %v924_v23, %s1643_s0 }
 0xc89   :  { %v873_v27 = vpop.permute.xlu1 %872 }
 0xc8a   :  { %v875_v30 = vmul.f32 %v873_v27, %v867_v28 }
 0xc8c   :  { %877 = vrot.lane.b32.xlu0 %v875_v30, %s1643_s0 }
 0xce0   :  { %v927_v47 = vpop.permute.xlu2 %926 }
 0xce1   :  { %v1903_v48 = vadd.f32 %v927_v47, %v919_v41 }
 0xce3   :  { %1535 = vtanh.f32 %v1903_v48  ;;  %v1073_v23 = vrot.slane %v1903_v48, 7 }
 0xce9   :  { %v1536_v49 = vpop.eup %1535 }
 0xcea   :  { %932 = vrot.lane.b32.xlu1 %v1536_v49, %s1642_s26 }
 0xcfe   :  { %v878_v51 = vpop.permute.xlu0 %877 }
 0xcff   :  { %v1908_v53 = vadd.f32 %v878_v51, %v870_v50 }
 0xd01   :  { %1537 = vtanh.f32 %v1908_v53 }
 0xd07   :  { %v1538_v29 = vpop.eup %1537 }
 0xd08   :  { %883 = vrot.lane.b32.xlu2 %v1538_v29, %s1642_s26 }
 0xd5c   :  { %v933_v56 = vpop.permute.xlu1 %932 }
 0xd5d   :  { %v935_v57 = vmul.f32 %v933_v56, %v913_v21 }
 0xd5f   :  { %v937_v58 = vrot.slane %v935_v57, 5 }
 0xd61   :  { %938 = vrot.lane.b32.xlu1 %v937_v58, %s1643_s0 }
 0xd62   :  { %v884_v42 = vpop.permute.xlu2 %883 }
 0xd63   :  { %v886_v31 = vmul.f32 %v884_v42, %v867_v28 }
 0xd65   :  { %888 = vrot.lane.b32.xlu0 %v886_v31, %s1643_s0 }
 0xdd3   :  { %v939_v61 = vpop.permute.xlu1 %938 }
 0xdd4   :  { %1428 = vmatmul.msk.f32.vlgmr.msra.gmra.mxu1 %vm154_vm5, %v939_v61  ;;  %1429 = vmatmul.msk.f32.vlgmr.msra.gmra.mxu2 %vm154_vm5, %v939_v61 }
 0xdd7   :  { %v889_v60 = vpop.permute.xlu0 %888 }
 0xdd8   :  { %891 = vst.msk [vmem:[#allocation2 + $0x4] sm:$0x1] %vm266_vm14, %v889_v60  ;;  %1430 = vmatmul.msk.f32.vlgmr.msrb.gmra.mxu3 %vm154_vm5, %v889_v60 }
 0xe51   :  { %v959_v55 = vpop.f32.mrf.mxu1 }
 0xe52   :  { %v1049_v62 = vrot.slane %v959_v55, 2 }
 0xe54   :  { %v1051_v63 = vadd.f32 %v1049_v62, %v1677_v12 }
 0xe56   :  { %1539 = vtanh.f32 %v1051_v63  ;;  %v1432_v38 = vmul.f32 -1.442695, %v1051_v63 }
 0xe57   :  { %v979_v0 = vpop.f32.mrf.mxu2 }
 0xe5b   :  { %v1001_v52 = vpop.f32.mrf.mxu3 }
 0xe5c   :  { %v1540_v33 = vpop.eup %1539  ;;  %v1004_v59 = vadd.f32 %v1001_v52, %v979_v0 }
 0xe5d   :  { %1077 = vrot.lane.b32.xlu2 %v1540_v33, %s1642_s26 }
 0xe5e   :  { %v1005_v34 = vadd.f32 %v1004_v59, %v1761_v54 }
 0xe60   :  { %1541 = vtanh.f32 %v1005_v34  ;;  %v1431_v43 = vmul.f32 -1.442695, %v1005_v34 }
 0xe61   :  { %1543 = vpow2.f32 %v1432_v38 }
 0xe66   :  { %v1542_v36 = vpop.eup %1541 }
 0xe67   :  { %1028 = vrot.lane.b32.xlu0 %v1542_v36, %s1642_s26  ;;  %v1544_v35 = vpop.eup %1543 }
 0xe68   :  { %v1055_v40 = vadd.f32 1.0, %v1544_v35 }
 0xe6a   :  { %1545 = vrcp.f32 %v1055_v40  ;;  %v1067_v46 = vand.u32 2147483648, %v1055_v40  ;;  %vm1061_vm4 = vweird.f32 %v1055_v40  ;;  %v1065_v2 = vand.u32 2147483647, %v1055_v40 }
 0xe6b   :  { %1547 = vpow2.f32 %v1431_v43 }
 0xe6c   :  { %v1068_v4 = vor.u32 1.1754944e-38, %v1067_v46  ;;  %vm1066_vm7 = vcmp.eq.f32.partialorder %v1065_v2, 8.507059e+37 }
 0xe70   :  { %v1546_v37 = vpop.eup %1545 }
 0xe71   :  { %v1057_v1 = vmul.f32 %v1546_v37, %v1055_v40  ;;  %vm1062_vm3 = vweird.f32 %v1546_v37  ;;  %v1548_v5 = vpop.eup %1547 }
 0xe72   :  { %vm1063_vm6 = vmor %vm1061_vm4, %vm1062_vm3  ;;  %v1009_v9 = vadd.f32 1.0, %v1548_v5 }
 0xe73   :  { %v1058_v39 = vsub.f32 1.0, %v1057_v1 }
 0xe74   :  { %1549 = vrcp.f32 %v1009_v9  ;;  %v1021_v16 = vand.u32 2147483648, %v1009_v9  ;;  %vm1015_vm9 = vweird.f32 %v1009_v9  ;;  %v1019_v17 = vand.u32 2147483647, %v1009_v9 }
 0xe75   :  { %v1059_v44 = vmul.f32 %v1546_v37, %v1058_v39 }
 0xe76   :  { %v1022_v19 = vor.u32 1.1754944e-38, %v1021_v16  ;;  %vm1020_vm11 = vcmp.eq.f32.partialorder %v1019_v17, 8.507059e+37 }
 0xe77   :  { %v1060_v45 = vadd.f32 %v1546_v37, %v1059_v44 }
 0xe79   :  { %v1064_v3 = vsel %vm1063_vm6, %v1546_v37, %v1060_v45 }
 0xe7a   :  { %v1069_v6 = vsel %vm1066_vm7, %v1068_v4, %v1064_v3  ;;  %v1550_v10 = vpop.eup %1549 }
 0xe7b   :  { %v1011_v11 = vmul.f32 %v1550_v10, %v1009_v9  ;;  %vm1016_vm8 = vweird.f32 %v1550_v10  ;;  %v1075_v24 = vmul.f32 %v1073_v23, %v1069_v6 }
 0xe7c   :  { %vm1017_vm10 = vmor %vm1015_vm9, %vm1016_vm8 }
 0xe7d   :  { %v1012_v13 = vsub.f32 1.0, %v1011_v11 }
 0xe7f   :  { %v1013_v14 = vmul.f32 %v1550_v10, %v1012_v13 }
 0xe81   :  { %v1014_v15 = vadd.f32 %v1550_v10, %v1013_v14 }
 0xe83   :  { %v1018_v18 = vsel %vm1017_vm10, %v1550_v10, %v1014_v15 }
 0xe84   :  { %v1023_v21 = vsel %vm1020_vm11, %v1022_v19, %v1018_v18 }
 0xe85   :  { %v1026_v28 = vmul.f32 %v1023_v21, %v1908_v53 }
 0xeb7   :  { %v1078_v7 = vpop.permute.xlu2 %1077 }
 0xeb8   :  { %v1080_v8 = vmul.f32 %v1078_v7, %v1069_v6 }
 0xeba   :  { %1082 = vrot.lane.b32.xlu1 %v1080_v8, %s1643_s0 }
 0xed9   :  { %v1029_v20 = vpop.permute.xlu0 %1028 }
 0xeda   :  { %v1031_v22 = vmul.f32 %v1029_v20, %v1023_v21 }
 0xedc   :  { %1033 = vrot.lane.b32.xlu2 %v1031_v22, %s1643_s0 }
 0xf2c   :  { %v1083_v25 = vpop.permute.xlu1 %1082 }
 0xf2d   :  { %v1925_v26 = vadd.f32 %v1083_v25, %v1075_v24 }
 0xf2f   :  { %1551 = vtanh.f32 %v1925_v26  ;;  %v1229_v15 = vrot.slane %v1925_v26, 7 }
 0xf35   :  { %v1552_v27 = vpop.eup %1551 }
 0xf36   :  { %1088 = vrot.lane.b32.xlu0 %v1552_v27, %s1642_s26  ;;  %v1034_v30 = vpop.permute.xlu2 %1033 }
 0xf37   :  { %v1930_v32 = vadd.f32 %v1034_v30, %v1026_v28 }
 0xf39   :  { %1553 = vtanh.f32 %v1930_v32 }
 0xf3f   :  { %v1554_v41 = vpop.eup %1553 }
 0xf40   :  { %1039 = vrot.lane.b32.xlu1 %v1554_v41, %s1642_s26 }
 0xfa8   :  { %v1089_v47 = vpop.permute.xlu0 %1088 }
 0xfa9   :  { %v1091_v48 = vmul.f32 %v1089_v47, %v1069_v6 }
 0xfab   :  { %v1093_v49 = vrot.slane %v1091_v48, 6 }
 0xfad   :  { %1094 = vrot.lane.b32.xlu2 %v1093_v49, %s1643_s0 }
 0xfb2   :  { %v1040_v50 = vpop.permute.xlu1 %1039 }
 0xfb3   :  { %v1042_v51 = vmul.f32 %v1040_v50, %v1023_v21 }
 0xfb5   :  { %1044 = vrot.lane.b32.xlu0 %v1042_v51, %s1643_s0 }
0x1007   :  { %v1095_v53 = vpop.permute.xlu2 %1094 }
0x1008   :  { %1433 = vmatmul.msk.f32.vlgmr.msrb.gmra.mxu0 %vm154_vm5, %v1095_v53  ;;  %1434 = vmatmul.msk.f32.vlgmr.msrb.gmra.mxu1 %vm154_vm5, %v1095_v53 }
0x1027   :  { %v1045_v29 = vpop.permute.xlu0 %1044 }
0x1028   :  { %1047 = vst.msk [vmem:[#allocation2 + $0x5] sm:$0x1] %vm266_vm14, %v1045_v29  ;;  %1435 = vmatmul.msk.f32.vlgmr.msrb.gmra.mxu2 %vm154_vm5, %v1045_v29 }
0x1085   :  { %v1115_v56 = vpop.f32.mrf.mxu0  ;;  %v1135_v31 = vpop.f32.mrf.mxu1 }
0x1086   :  { %v1205_v57 = vrot.slane %v1115_v56, 1 }
0x1088   :  { %v1207_v58 = vadd.f32 %v1205_v57, %v1677_v12 }
0x108a   :  { %1555 = vtanh.f32 %v1207_v58  ;;  %v1437_v63 = vmul.f32 -1.442695, %v1207_v58 }
0x1090   :  { %v1556_v42 = vpop.eup %1555 }
0x1091   :  { %1233 = vrot.lane.b32.xlu1 %v1556_v42, %s1642_s26 }
0x10ab   :  { %v1157_v61 = vpop.f32.mrf.mxu2 }
0x10ac   :  { %v1160_v60 = vadd.f32 %v1157_v61, %v1135_v31 }
0x10ae   :  { %v1161_v55 = vadd.f32 %v1160_v60, %v1761_v54 }
0x10b0   :  { %1557 = vtanh.f32 %v1161_v55  ;;  %v1436_v33 = vmul.f32 -1.442695, %v1161_v55 }
0x10b1   :  { %1559 = vpow2.f32 %v1437_v63 }
0x10b6   :  { %v1558_v62 = vpop.eup %1557 }
0x10b7   :  { %1184 = vrot.lane.b32.xlu2 %v1558_v62, %s1642_s26  ;;  %v1560_v0 = vpop.eup %1559 }
0x10b8   :  { %v1211_v52 = vadd.f32 1.0, %v1560_v0 }
0x10ba   :  { %1561 = vrcp.f32 %v1211_v52  ;;  %v1223_v1 = vand.u32 2147483648, %v1211_v52  ;;  %vm1217_vm13 = vweird.f32 %v1211_v52  ;;  %v1221_v39 = vand.u32 2147483647, %v1211_v52 }
0x10bb   :  { %1563 = vpow2.f32 %v1436_v33 }
0x10bc   :  { %v1224_v45 = vor.u32 1.1754944e-38, %v1223_v1  ;;  %vm1222_vm0 = vcmp.eq.f32.partialorder %v1221_v39, 8.507059e+37 }
0x10c0   :  { %v1562_v12 = vpop.eup %1561 }
0x10c1   :  { %v1564_v59 = vpop.eup %1563  ;;  %v1213_v34 = vmul.f32 %v1562_v12, %v1211_v52  ;;  %vm1218_vm12 = vweird.f32 %v1562_v12 }
0x10c2   :  { %v1165_v36 = vadd.f32 1.0, %v1564_v59  ;;  %vm1219_vm15 = vmor %vm1217_vm13, %vm1218_vm12 }
0x10c3   :  { %v1214_v38 = vsub.f32 1.0, %v1213_v34 }
0x10c4   :  { %1565 = vrcp.f32 %v1165_v36  ;;  %v1177_v7 = vand.u32 2147483648, %v1165_v36  ;;  %vm1171_vm2 = vweird.f32 %v1165_v36  ;;  %v1175_v8 = vand.u32 2147483647, %v1165_v36 }
0x10c5   :  { %v1215_v35 = vmul.f32 %v1562_v12, %v1214_v38  ;;  %v61_v38 = vld [vmem:[#allocation3 + $0x78] sm:$0xff] }
0x10c6   :  { %v1178_v10 = vor.u32 1.1754944e-38, %v1177_v7  ;;  %vm1176_vm4 = vcmp.eq.f32.partialorder %v1175_v8, 8.507059e+37  ;;  %1357 = vmatpush.msra.mxu1 %v61_v38  ;;  %v68_v7 = vld [vmem:[#allocation3 + $0xb0] sm:$0xff]  ;;  %v1583_v8 = vld [vmem:[#allocation3 + $0x100] sm:$0xff] }
0x10c7   :  { %v1216_v37 = vadd.f32 %v1562_v12, %v1215_v35  ;;  %v60_v35 = vld [vmem:[#allocation3 + $0x70] sm:$0xff] }
0x10c8   :  { %1358 = vmatpush.msra.mxu1 %v60_v35 }
0x10c9   :  { %v1220_v44 = vsel %vm1219_vm15, %v1562_v12, %v1216_v37  ;;  %v58_v37 = vld [vmem:[#allocation3 + $0x60] sm:$0xff] }
0x10ca   :  { %v1566_v40 = vpop.eup %1565  ;;  %v1225_v3 = vsel %vm1222_vm0, %v1224_v45, %v1220_v44  ;;  %v76_v44 = vld [vmem:[#allocation3 + $0xf0] sm:$0xff]  ;;  %v75_v45 = vld [vmem:[#allocation3 + $0xe8] sm:$0xff] }
0x10cb   :  { %v1167_v43 = vmul.f32 %v1566_v40, %v1165_v36  ;;  %vm1172_vm1 = vweird.f32 %v1566_v40  ;;  %v1231_v16 = vmul.f32 %v1229_v15, %v1225_v3  ;;  %v65_v15 = vld [vmem:[#allocation3 + $0x98] sm:$0xff] }
0x10cc   :  { %vm1173_vm3 = vmor %vm1171_vm2, %vm1172_vm1 }
0x10cd   :  { %v1168_v46 = vsub.f32 1.0, %v1167_v43  ;;  %v77_v43 = vld [vmem:[#allocation3 + $0xf8] sm:$0xff] }
0x10ce   :  { %1370 = vmatpush.msra.mxu2 %v77_v43 }
0x10cf   :  { %v1169_v5 = vmul.f32 %v1566_v40, %v1168_v46  ;;  %v74_v46 = vld [vmem:[#allocation3 + $0xe0] sm:$0xff] }
0x10d0   :  { %1371 = vmatpush.msra.mxu2 %v76_v44 }
0x10d1   :  { %v1170_v6 = vadd.f32 %v1566_v40, %v1169_v5  ;;  %v70_v5 = vld [vmem:[#allocation3 + $0xc0] sm:$0xff] }
0x10d2   :  { %1372 = vmatpush.msra.mxu2 %v75_v45 }
0x10d3   :  { %v1174_v9 = vsel %vm1173_vm3, %v1566_v40, %v1170_v6  ;;  %v59_v40 = vld [vmem:[#allocation3 + $0x68] sm:$0xff]  ;;  %v69_v6 = vld [vmem:[#allocation3 + $0xb8] sm:$0xff] }
0x10d4   :  { %v1179_v13 = vsel %vm1176_vm4, %v1178_v10, %v1174_v9  ;;  %1359 = vmatpush.msra.mxu1 %v59_v40  ;;  %1373 = vmatpush.msra.mxu2 %v74_v46  ;;  %v1341_v9 = vperm.slane %v1583_v8, 2 }
0x10d5   :  { %v1182_v20 = vmul.f32 %v1179_v13, %v1930_v32 }
0x10d6   :  { %1360 = vmatpush.msra.mxu1 %v58_v37 }
0x1103   :  { %v1234_v2 = vpop.permute.xlu1 %1233 }
0x1104   :  { %v1236_v4 = vmul.f32 %v1234_v2, %v1225_v3  ;;  %v73_v2 = vld [vmem:[#allocation3 + $0xd8] sm:$0xff] }
0x1105   :  { %1374 = vmatpush.msra.mxu2 %v73_v2 }
0x1106   :  { %1238 = vrot.lane.b32.xlu0 %v1236_v4, %s1643_s0  ;;  %v71_v4 = vld [vmem:[#allocation3 + $0xc8] sm:$0xff] }
0x1111   :  { %v1185_v11 = vpop.permute.xlu2 %1184 }
0x1112   :  { %v1187_v14 = vmul.f32 %v1185_v11, %v1179_v13 }
0x1114   :  { %1189 = vrot.lane.b32.xlu1 %v1187_v14, %s1643_s0  ;;  %v66_v14 = vld [vmem:[#allocation3 + $0xa0] sm:$0xff] }
0x1178   :  { %v1239_v17 = vpop.permute.xlu0 %1238 }
0x1179   :  { %v1241_v18 = vadd.f32 %v1239_v17, %v1231_v16  ;;  %v64_v16 = vld [vmem:[#allocation3 + $0x90] sm:$0xff]  ;;  %v63_v17 = vld [vmem:[#allocation3 + $0x88] sm:$0xff] }
0x117b   :  { %1567 = vtanh.f32 %v1241_v18  ;;  %v62_v18 = vld [vmem:[#allocation3 + $0x80] sm:$0xff] }
0x1181   :  { %v1568_v19 = vpop.eup %1567 }
0x1182   :  { %1244 = vrot.lane.b32.xlu2 %v1568_v19, %s1642_s26 }
0x1186   :  { %v1190_v21 = vpop.permute.xlu1 %1189 }
0x1187   :  { %v1192_v22 = vadd.f32 %v1190_v21, %v1182_v20 }
0x1189   :  { %1569 = vtanh.f32 %v1192_v22 }
0x118f   :  { %v1570_v23 = vpop.eup %1569 }
0x1190   :  { %1195 = vrot.lane.b32.xlu0 %v1570_v23, %s1642_s26 }
0x11dc   :  { %v1245_v24 = vpop.permute.xlu2 %1244 }
0x11dd   :  { %v1247_v25 = vmul.f32 %v1245_v24, %v1225_v3  ;;  %v72_v3 = vld [vmem:[#allocation3 + $0xd0] sm:$0xff] }
0x11de   :  { %1375 = vmatpush.msra.mxu2 %v72_v3 }
0x11df   :  { %v1249_v27 = vrot.slane %v1247_v25, 7 }
0x11e0   :  { %1376 = vmatpush.msra.mxu2 %v71_v4 }
0x11e1   :  { %1250 = vrot.lane.b32.xlu1 %v1249_v27, %s1643_s0 }
0x11e2   :  { %1377 = vmatpush.msra.mxu2 %v70_v5 }
0x11e4   :  { %1378 = vmatpush.msra.mxu2 %v69_v6 }
0x11e6   :  { %1379 = vmatpush.msra.mxu2 %v68_v7 }
0x1202   :  { %v1196_v26 = vpop.permute.xlu0 %1195 }
0x1203   :  { %v1198_v28 = vmul.f32 %v1196_v26, %v1179_v13  ;;  %v67_v13 = vld [vmem:[#allocation3 + $0xa8] sm:$0xff] }
0x1204   :  { %1380 = vmatpush.msra.mxu2 %v67_v13 }
0x1205   :  { %1200 = vrot.lane.b32.xlu2 %v1198_v28, %s1643_s0 }
0x1206   :  { %1381 = vmatpush.msra.mxu2 %v66_v14 }
0x1208   :  { %1382 = vmatpush.msra.mxu2 %v65_v15 }
0x120a   :  { %1383 = vmatpush.msra.mxu2 %v64_v16 }
0x120c   :  { %1384 = vmatpush.msra.mxu2 %v63_v17 }
0x120e   :  { %1385 = vmatpush.msra.mxu2 %v62_v18 }
0x1253   :  { %v1251_v30 = vpop.permute.xlu1 %1250 }
0x1254   :  { %1438 = vmatmul.msk.f32.vlgmr.msra.gmra.mxu3 %vm154_vm5, %v1251_v30 }
0x125f   :  { %v1201_v41 = vpop.permute.xlu2 %1200 }
0x1260   :  { %1203 = vst.msk [vmem:[#allocation2 + $0x6] sm:$0x1] %vm266_vm14, %v1201_v41  ;;  %1439 = vmatmul.msk.f32.vlgmr.msra.gmra.mxu0 %vm154_vm5, %v1201_v41 }
0x12d7   :  { %v1271_v32 = vpop.f32.mrf.mxu3 }
0x12dd   :  { %v1293_v47 = vpop.f32.mrf.mxu0 }
0x12de   :  { %v1296_v48 = vadd.f32 %v1293_v47, %v1271_v32 }
0x12e0   :  { %v1297_v49 = vadd.f32 %v1296_v48, %v1761_v54 }
0x12e2   :  { %1571 = vtanh.f32 %v1297_v49  ;;  %v1440_v51 = vmul.f32 -1.442695, %v1297_v49 }
0x12e4   :  { %1573 = vpow2.f32 %v1440_v51 }
0x12e8   :  { %v1572_v50 = vpop.eup %1571 }
0x12e9   :  { %1320 = vrot.lane.b32.xlu0 %v1572_v50, %s1642_s26 }
0x12ea   :  { %v1574_v53 = vpop.eup %1573 }
0x12eb   :  { %v1301_v29 = vadd.f32 1.0, %v1574_v53 }
0x12ed   :  { %1575 = vrcp.f32 %v1301_v29  ;;  %v1313_v61 = vand.u32 2147483648, %v1301_v29  ;;  %vm1307_vm7 = vweird.f32 %v1301_v29  ;;  %v1311_v60 = vand.u32 2147483647, %v1301_v29 }
0x12ef   :  { %v1314_v55 = vor.u32 1.1754944e-38, %v1313_v61  ;;  %vm1312_vm9 = vcmp.eq.f32.partialorder %v1311_v60, 8.507059e+37 }
0x12f3   :  { %v1576_v56 = vpop.eup %1575 }
0x12f4   :  { %v1303_v57 = vmul.f32 %v1576_v56, %v1301_v29  ;;  %vm1308_vm6 = vweird.f32 %v1576_v56 }
0x12f5   :  { %vm1309_vm8 = vmor %vm1307_vm7, %vm1308_vm6 }
0x12f6   :  { %v1304_v58 = vsub.f32 1.0, %v1303_v57 }
0x12f8   :  { %v1305_v42 = vmul.f32 %v1576_v56, %v1304_v58 }
0x12fa   :  { %v1306_v31 = vadd.f32 %v1576_v56, %v1305_v42 }
0x12fc   :  { %v1310_v54 = vsel %vm1309_vm8, %v1576_v56, %v1306_v31 }
0x12fd   :  { %v1315_v63 = vsel %vm1312_vm9, %v1314_v55, %v1310_v54 }
0x12fe   :  { %v1318_v52 = vmul.f32 %v1315_v63, %v1192_v22 }
0x135b   :  { %v1321_v62 = vpop.permute.xlu0 %1320 }
0x135c   :  { %v1323_v0 = vmul.f32 %v1321_v62, %v1315_v63 }
0x135e   :  { %1325 = vrot.lane.b32.xlu1 %v1323_v0, %s1643_s0 }
0x13d0   :  { %v1326_v33 = vpop.permute.xlu1 %1325 }
0x13d1   :  { %v1328_v12 = vadd.f32 %v1326_v33, %v1318_v52 }
0x13d3   :  { %1577 = vtanh.f32 %v1328_v12 }
0x13d9   :  { %v1578_v59 = vpop.eup %1577 }
0x13da   :  { %1331 = vrot.lane.b32.xlu2 %v1578_v59, %s1642_s26 }
0x1434   :  { %v1332_v34 = vpop.permute.xlu2 %1331 }
0x1435   :  { %v1334_v36 = vmul.f32 %v1332_v34, %v1315_v63 }
0x1437   :  { %1336 = vrot.lane.b32.xlu0 %v1334_v36, %s1643_s0 }
0x14a9   :  { %v1337_v1 = vpop.permute.xlu0 %1336 }
0x14aa   :  { %1339 = vst.msk [vmem:[#allocation2 + $0x7] sm:$0x1] %vm266_vm14, %v1337_v1 }
0x14b1   :  { %v1340_v39 = vld [vmem:[#allocation2] sm:$0xff] }
0x14b2   :  { %1441 = vmatmul.msk.f32.vlgmr.msra.gmra.mxu1 %vm154_vm5, %v1340_v39 }
0x152f   :  { %v1362_v10 = vpop.f32.mrf.mxu1 }
0x1530   :  { %v1363_v11 = vadd.f32 %v1362_v10, %v1341_v9 }
0x1532   :  { %1365 = vmax.xlane.f32.xlu1 %v1363_v11 }
0x15a5   :  { %v1366_v19 = vpop.xlane.xlu1 %1365 }
0x15a6   :  { %v1367_v20 = vsub.f32 %v1363_v11, %v1366_v19 }
0x15a8   :  { %v1368_v21 = vmul.f32 1.442695, %v1367_v20 }
0x15aa   :  { %1579 = vpow2.f32 %v1368_v21 }
0x15b0   :  { %v1580_v22 = vpop.eup %1579 }
0x15b1   :  { %1386 = vmatmul.f32.vlgmr.msra.gmra.mxu2 %v1580_v22 }
0x1634   :  { %v1387_v23 = vpop.f32.mrf.mxu2 }
0x1635   :  { %1581 = vrcp.f32 %v1387_v23 }
0x163b   :  { %v1582_v24 = vpop.eup %1581 }
0x163c   :  { %v1391_v25 = vmul.f32 %v1582_v24, %v1387_v23 }
0x163e   :  { %v1392_v27 = vsub.f32 2.0, %v1391_v25 }
0x1640   :  { %v1393_v26 = vmul.f32 %v1582_v24, %v1392_v27 }
0x1642   :  { %v1394_v28 = vmul.f32 %v1580_v22, %v1393_v26 }
0x1644   :  { %1395 = vst [vmem:[%s1968_s3] sm:$0xff] %v1394_v28 }
0x1645   :  { %1400 = vsyncpa [#allocation4], 1 }
0x1646   :  { %1401 = vsyncpa [#allocation6], 1 }

</bundles_post_ra>
